<compile_context>
chip_gen: v7x
topology: tpu7x:2x2x1
jax: 0.10.0
libtpu: 0.0.40
codegen_flags: <defaults>
</compile_context>

<pallas_src>
import functools

import jax
import jax.numpy as jnp
import numpy as np
from jax import lax
from jax.experimental import pallas as pl
from jax.experimental.pallas import tpu as pltpu


# ----------------------------------------------------------------------------
# Fused kernel: one batch element per grid step.
# ----------------------------------------------------------------------------
def _down_kernel(x_ref, w1_ref, p1_ref, w2_ref, p2_ref, o_ref,
                 pad1_ref, pat1_ref, pad2_ref, pat2_ref,
                 *, Hp, Wp, cin, mid, cout, eps):
    """MaxPool2d(2) -> (conv3x3 -> GroupNorm(1) -> ReLU) x 2 for one sample.

    The input block is the sample viewed as (1, 2*Hp, Wp, 2*cin): the even/odd
    W pair is folded into the channel axis by a free wrapper reshape so the
    2x2 pool needs no strided HBM reads and no minor-dim relayout in-kernel.
    """
    # ---- 2x2 max pool ------------------------------------------------------
    x = x_ref[0]                                             # (2*Hp, Wp, 2*cin)
    x = jnp.max(x.reshape(Hp, 2, Wp, 2 * cin), axis=1)       # pool over rows
    pooled = jnp.maximum(x[:, :, :cin], x[:, :, cin:])       # pool over cols
    # pooled: (Hp, Wp, cin)

    def conv3x3_gn_relu(img, c, c_out, pad_ref, pat_ref, w_ref, p_ref):
        # Zero-pad the image into VMEM scratch (halo never touches HBM).
        pad_ref[...] = jnp.zeros((Hp + 2, Wp + 2, c), jnp.float32)
        pad_ref[1:Hp + 1, 1:Wp + 1, :] = img
        xpad = pad_ref[...]                                   # (Hp+2, Wp+2, c)
        # im2col: assemble the (Hp*Wp, 9*c) patch matrix once, then a single
        # MXU matmul with contraction depth K = 9*c.
        for dy in range(3):
            for dx in range(3):
                t = dy * 3 + dx
                pat_ref[:, t * c:(t + 1) * c] = (
                    xpad[dy:dy + Hp, dx:dx + Wp, :].reshape(Hp * Wp, c))
        y = jnp.dot(pat_ref[...], w_ref[...],
                    preferred_element_type=jnp.float32)       # (Hp*Wp, c_out)
        prm = p_ref[...]                                      # (3, c_out): bias, gamma, beta
        y = y + prm[0:1, :]                                   # conv bias
        # GroupNorm(num_groups=1): per-sample stats over (H, W, C), biased var.
        mu = jnp.mean(y)
        var = jnp.mean((y - mu) ** 2)
        y = (y - mu) * lax.rsqrt(var + eps)
        return jnp.maximum(y * prm[1:2, :] + prm[2:3, :], 0.0)  # affine + ReLU

    h = conv3x3_gn_relu(pooled, cin, mid, pad1_ref, pat1_ref, w1_ref, p1_ref)
    y = conv3x3_gn_relu(h.reshape(Hp, Wp, mid), mid, cout,
                        pad2_ref, pat2_ref, w2_ref, p2_ref)
    o_ref[...] = y.reshape(1, Hp, Wp, cout).astype(o_ref.dtype)


# ----------------------------------------------------------------------------
# Wrapper: layout / parameter glue + pallas_call.
# ----------------------------------------------------------------------------
def down_pallas(x_nchw, params, *, eps=1e-5):
    N, Cin, H, W = x_nchw.shape
    assert H % 2 == 0 and W % 2 == 0, "MaxPool2d(2) expects even H, W"
    Hp, Wp = H // 2, W // 2
    Mid = params["w1"].shape[0]
    Cout = params["w2"].shape[0]

    # Layout glue (XLA): NCHW -> NHWC, then fold the even/odd W pair into the
    # channel axis (contiguous, free reshape) so the kernel reads the input
    # once and pools without strided HBM access.
    x = jnp.transpose(x_nchw, (0, 2, 3, 1)).reshape(N, H, Wp, 2 * Cin)

    # Parameter glue (XLA): tap-major im2col weights (9*Cin, Cout); pack
    # (bias, gamma, beta) per conv into a single (3, C) array.
    w1 = jnp.transpose(params["w1"], (2, 3, 1, 0)).reshape(9 * Cin, Mid)
    w2 = jnp.transpose(params["w2"], (2, 3, 1, 0)).reshape(9 * Mid, Cout)
    p1 = jnp.stack([params["b1"], params["g1"], params["beta1"]])   # (3, Mid)
    p2 = jnp.stack([params["b2"], params["g2"], params["beta2"]])   # (3, Cout)

    kernel = functools.partial(_down_kernel, Hp=Hp, Wp=Wp,
                               cin=Cin, mid=Mid, cout=Cout, eps=eps)
    const2d = lambda n: (0, 0)          # weights/params: resident across grid
    out = pl.pallas_call(
        kernel,
        out_shape=jax.ShapeDtypeStruct((N, Hp, Wp, Cout), x_nchw.dtype),
        grid=(N,),
        in_specs=[
            pl.BlockSpec((1, H, Wp, 2 * Cin), lambda n: (n, 0, 0, 0)),
            pl.BlockSpec((9 * Cin, Mid), const2d),
            pl.BlockSpec((3, Mid), const2d),
            pl.BlockSpec((9 * Mid, Cout), const2d),
            pl.BlockSpec((3, Cout), const2d),
        ],
        out_specs=pl.BlockSpec((1, Hp, Wp, Cout), lambda n: (n, 0, 0, 0)),
        scratch_shapes=[
            pltpu.VMEM((Hp + 2, Wp + 2, Cin), jnp.float32),   # padded pooled img
            pltpu.VMEM((Hp * Wp, 9 * Cin), jnp.float32),      # im2col patches 1
            pltpu.VMEM((Hp + 2, Wp + 2, Mid), jnp.float32),   # padded hidden img
            pltpu.VMEM((Hp * Wp, 9 * Mid), jnp.float32),      # im2col patches 2
        ],
        compiler_params=pltpu.CompilerParams(
            dimension_semantics=("parallel",)),
    )(x, w1, p1, w2, p2)
    return jnp.transpose(out, (0, 3, 1, 2))                   # NHWC -> NCHW


down_forward = jax.jit(down_pallas)


# ----------------------------------------------------------------------------
# Parameter init (matches PyTorch Down(in, out): mid_channels == out_channels)
# ----------------------------------------------------------------------------
def init_down_params(key, in_channels, out_channels):
    mid = out_channels
    k1, k2 = jax.random.split(key)
    s1 = 1.0 / np.sqrt(in_channels * 9)
    s2 = 1.0 / np.sqrt(mid * 9)
    return {
        "w1": jax.random.uniform(k1, (mid, in_channels, 3, 3),
                                 jnp.float32, -s1, s1),
        "b1": jnp.zeros((mid,), jnp.float32),
        "g1": jnp.ones((mid,), jnp.float32),
        "beta1": jnp.zeros((mid,), jnp.float32),
        "w2": jax.random.uniform(k2, (out_channels, mid, 3, 3),
                                 jnp.float32, -s2, s2),
        "b2": jnp.zeros((out_channels,), jnp.float32),
        "g2": jnp.ones((out_channels,), jnp.float32),
        "beta2": jnp.zeros((out_channels,), jnp.float32),
    }


# -------------------------- pure-JAX reference ------------------------------
def _ref_block(x, w, b, g, bt, eps=1e-5):
    y = lax.conv_general_dilated(x, w, (1, 1), ((1, 1), (1, 1)),
                                 dimension_numbers=("NCHW", "OIHW", "NCHW"))
    y = y + b[None, :, None, None]
    mu = y.mean(axis=(1, 2, 3), keepdims=True)
    var = ((y - mu) ** 2).mean(axis=(1, 2, 3), keepdims=True)
    y = (y - mu) / jnp.sqrt(var + eps)
    y = y * g[None, :, None, None] + bt[None, :, None, None]
    return jnp.maximum(y, 0.0)


def down_ref(x_nchw, p):
    N, C, H, W = x_nchw.shape
    x = x_nchw.reshape(N, C, H // 2, 2, W // 2, 2).max(axis=(3, 5))
    x = _ref_block(x, p["w1"], p["b1"], p["g1"], p["beta1"])
    x = _ref_block(x, p["w2"], p["b2"], p["g2"], p["beta2"])
    return x


if __name__ == "__main__":
    key = jax.random.PRNGKey(0)
    kx, kp = jax.random.split(key)

    in_channels, out_channels = 4, 8
    x = jax.random.normal(kx, (2, in_channels, 16, 16), jnp.float32)
    params = init_down_params(kp, in_channels, out_channels)

    out = jax.block_until_ready(down_forward(x, params))

    ref = down_ref(x, params)
    assert out.shape == (2, out_channels, 8, 8), out.shape
    np.testing.assert_allclose(np.asarray(out), np.asarray(ref),
                               rtol=1e-4, atol=1e-4)
    print("KERNEL_OK")
</pallas_src>

<mosaic_0001>
module attributes {stable_mosaic.version = 11 : i64} {
  func.func @_down_kernel(%arg0: i32, %arg1: memref<1x16x8x8xf32, #tpu.memory_space<vmem>>, %arg2: memref<36x8xf32, #tpu.memory_space<vmem>>, %arg3: memref<3x8xf32, #tpu.memory_space<vmem>>, %arg4: memref<72x8xf32, #tpu.memory_space<vmem>>, %arg5: memref<3x8xf32, #tpu.memory_space<vmem>>, %arg6: memref<1x8x8x8xf32, #tpu.memory_space<vmem>>, %arg7: memref<10x10x4xf32, #tpu.memory_space<vmem>>, %arg8: memref<64x36xf32, #tpu.memory_space<vmem>>, %arg9: memref<10x10x8xf32, #tpu.memory_space<vmem>>, %arg10: memref<64x72xf32, #tpu.memory_space<vmem>>) attributes {dimension_semantics = [#tpu.dimension_semantics<parallel>], iteration_bounds = array<i64: 2>, scalar_prefetch = 0 : i64, scratch_operands = 4 : i64, tpu.core_type = #tpu.core_type<tc>, window_params = [{transform_indices = @transform_0, window_bounds = array<i64: 1, 16, 8, 8>}, {pipeline_mode = #tpu.pipeline_mode<synchronous>, transform_indices = @transform_1, window_bounds = array<i64: 36, 8>}, {pipeline_mode = #tpu.pipeline_mode<synchronous>, transform_indices = @transform_2, window_bounds = array<i64: 3, 8>}, {pipeline_mode = #tpu.pipeline_mode<synchronous>, transform_indices = @transform_3, window_bounds = array<i64: 72, 8>}, {pipeline_mode = #tpu.pipeline_mode<synchronous>, transform_indices = @transform_4, window_bounds = array<i64: 3, 8>}, {transform_indices = @transform_5, window_bounds = array<i64: 1, 8, 8, 8>}]} {
    %c0 = arith.constant 0 : index
    %c0_0 = arith.constant 0 : index
    %c0_1 = arith.constant 0 : index
    %c0_2 = arith.constant 0 : index
    %0 = vector.load %arg1[%c0, %c0_0, %c0_1, %c0_2] : memref<1x16x8x8xf32, #tpu.memory_space<vmem>>, vector<1x16x8x8xf32>
    %1 = vector.shape_cast %0 : vector<1x16x8x8xf32> to vector<16x8x8xf32>
    %2 = vector.shape_cast %1 : vector<16x8x8xf32> to vector<8x2x8x8xf32>
    %cst = arith.constant dense<0xFF800000> : vector<8x8x8xf32>
    %3 = vector.multi_reduction <maximumf>, %2, %cst [1] : vector<8x2x8x8xf32> to vector<8x8x8xf32>
    %4 = vector.extract_strided_slice %3 {offsets = [0, 0, 0], sizes = [8, 8, 4], strides = [1, 1, 1]} : vector<8x8x8xf32> to vector<8x8x4xf32>
    %5 = vector.extract_strided_slice %3 {offsets = [0, 0, 4], sizes = [8, 8, 4], strides = [1, 1, 1]} : vector<8x8x8xf32> to vector<8x8x4xf32>
    %6 = arith.maximumf %4, %5 : vector<8x8x4xf32>
    %cst_3 = arith.constant 0.000000e+00 : f32
    %7 = vector.broadcast %cst_3 : f32 to vector<10x10x4xf32>
    %c0_4 = arith.constant 0 : index
    %c0_5 = arith.constant 0 : index
    %c0_6 = arith.constant 0 : index
    %8 = vector.load %arg7[%c0_4, %c0_5, %c0_6] : memref<10x10x4xf32, #tpu.memory_space<vmem>>, vector<10x10x4xf32>
    tpu.vector_store %arg7[%c0_4, %c0_5, %c0_6], %7 {strides = array<i32>} : memref<10x10x4xf32, #tpu.memory_space<vmem>>, vector<10x10x4xf32>,
    %c1 = arith.constant 1 : index
    %c1_7 = arith.constant 1 : index
    %c0_8 = arith.constant 0 : index
    %9 = vector.load %arg7[%c1, %c1_7, %c0_8] : memref<10x10x4xf32, #tpu.memory_space<vmem>>, vector<8x8x4xf32>
    tpu.vector_store %arg7[%c1, %c1_7, %c0_8], %6 {strides = array<i32>} : memref<10x10x4xf32, #tpu.memory_space<vmem>>, vector<8x8x4xf32>,
    %c0_9 = arith.constant 0 : index
    %c0_10 = arith.constant 0 : index
    %c0_11 = arith.constant 0 : index
    %10 = vector.load %arg7[%c0_9, %c0_10, %c0_11] : memref<10x10x4xf32, #tpu.memory_space<vmem>>, vector<10x10x4xf32>
    %11 = vector.extract_strided_slice %10 {offsets = [0, 0, 0], sizes = [8, 8, 4], strides = [1, 1, 1]} : vector<10x10x4xf32> to vector<8x8x4xf32>
    %12 = vector.shape_cast %11 : vector<8x8x4xf32> to vector<64x4xf32>
    %c0_12 = arith.constant 0 : index
    %c0_13 = arith.constant 0 : index
    %13 = vector.load %arg8[%c0_12, %c0_13] : memref<64x36xf32, #tpu.memory_space<vmem>>, vector<64x4xf32>
    tpu.vector_store %arg8[%c0_12, %c0_13], %12 {strides = array<i32>} : memref<64x36xf32, #tpu.memory_space<vmem>>, vector<64x4xf32>,
    %14 = vector.extract_strided_slice %10 {offsets = [0, 1, 0], sizes = [8, 8, 4], strides = [1, 1, 1]} : vector<10x10x4xf32> to vector<8x8x4xf32>
    %15 = vector.shape_cast %14 : vector<8x8x4xf32> to vector<64x4xf32>
    %c0_14 = arith.constant 0 : index
    %c4 = arith.constant 4 : index
    %16 = vector.load %arg8[%c0_14, %c4] : memref<64x36xf32, #tpu.memory_space<vmem>>, vector<64x4xf32>
    tpu.vector_store %arg8[%c0_14, %c4], %15 {strides = array<i32>} : memref<64x36xf32, #tpu.memory_space<vmem>>, vector<64x4xf32>,
    %17 = vector.extract_strided_slice %10 {offsets = [0, 2, 0], sizes = [8, 8, 4], strides = [1, 1, 1]} : vector<10x10x4xf32> to vector<8x8x4xf32>
    %18 = vector.shape_cast %17 : vector<8x8x4xf32> to vector<64x4xf32>
    %c0_15 = arith.constant 0 : index
    %c8 = arith.constant 8 : index
    %19 = vector.load %arg8[%c0_15, %c8] : memref<64x36xf32, #tpu.memory_space<vmem>>, vector<64x4xf32>
    tpu.vector_store %arg8[%c0_15, %c8], %18 {strides = array<i32>} : memref<64x36xf32, #tpu.memory_space<vmem>>, vector<64x4xf32>,
    %20 = vector.extract_strided_slice %10 {offsets = [1, 0, 0], sizes = [8, 8, 4], strides = [1, 1, 1]} : vector<10x10x4xf32> to vector<8x8x4xf32>
    %21 = vector.shape_cast %20 : vector<8x8x4xf32> to vector<64x4xf32>
    %c0_16 = arith.constant 0 : index
    %c12 = arith.constant 12 : index
    %22 = vector.load %arg8[%c0_16, %c12] : memref<64x36xf32, #tpu.memory_space<vmem>>, vector<64x4xf32>
    tpu.vector_store %arg8[%c0_16, %c12], %21 {strides = array<i32>} : memref<64x36xf32, #tpu.memory_space<vmem>>, vector<64x4xf32>,
    %23 = vector.extract_strided_slice %10 {offsets = [1, 1, 0], sizes = [8, 8, 4], strides = [1, 1, 1]} : vector<10x10x4xf32> to vector<8x8x4xf32>
    %24 = vector.shape_cast %23 : vector<8x8x4xf32> to vector<64x4xf32>
    %c0_17 = arith.constant 0 : index
    %c16 = arith.constant 16 : index
    %25 = vector.load %arg8[%c0_17, %c16] : memref<64x36xf32, #tpu.memory_space<vmem>>, vector<64x4xf32>
    tpu.vector_store %arg8[%c0_17, %c16], %24 {strides = array<i32>} : memref<64x36xf32, #tpu.memory_space<vmem>>, vector<64x4xf32>,
    %26 = vector.extract_strided_slice %10 {offsets = [1, 2, 0], sizes = [8, 8, 4], strides = [1, 1, 1]} : vector<10x10x4xf32> to vector<8x8x4xf32>
    %27 = vector.shape_cast %26 : vector<8x8x4xf32> to vector<64x4xf32>
    %c0_18 = arith.constant 0 : index
    %c20 = arith.constant 20 : index
    %28 = vector.load %arg8[%c0_18, %c20] : memref<64x36xf32, #tpu.memory_space<vmem>>, vector<64x4xf32>
    tpu.vector_store %arg8[%c0_18, %c20], %27 {strides = array<i32>} : memref<64x36xf32, #tpu.memory_space<vmem>>, vector<64x4xf32>,
    %29 = vector.extract_strided_slice %10 {offsets = [2, 0, 0], sizes = [8, 8, 4], strides = [1, 1, 1]} : vector<10x10x4xf32> to vector<8x8x4xf32>
    %30 = vector.shape_cast %29 : vector<8x8x4xf32> to vector<64x4xf32>
    %c0_19 = arith.constant 0 : index
    %c24 = arith.constant 24 : index
    %31 = vector.load %arg8[%c0_19, %c24] : memref<64x36xf32, #tpu.memory_space<vmem>>, vector<64x4xf32>
    tpu.vector_store %arg8[%c0_19, %c24], %30 {strides = array<i32>} : memref<64x36xf32, #tpu.memory_space<vmem>>, vector<64x4xf32>,
    %32 = vector.extract_strided_slice %10 {offsets = [2, 1, 0], sizes = [8, 8, 4], strides = [1, 1, 1]} : vector<10x10x4xf32> to vector<8x8x4xf32>
    %33 = vector.shape_cast %32 : vector<8x8x4xf32> to vector<64x4xf32>
    %c0_20 = arith.constant 0 : index
    %c28 = arith.constant 28 : index
    %34 = vector.load %arg8[%c0_20, %c28] : memref<64x36xf32, #tpu.memory_space<vmem>>, vector<64x4xf32>
    tpu.vector_store %arg8[%c0_20, %c28], %33 {strides = array<i32>} : memref<64x36xf32, #tpu.memory_space<vmem>>, vector<64x4xf32>,
    %35 = vector.extract_strided_slice %10 {offsets = [2, 2, 0], sizes = [8, 8, 4], strides = [1, 1, 1]} : vector<10x10x4xf32> to vector<8x8x4xf32>
    %36 = vector.shape_cast %35 : vector<8x8x4xf32> to vector<64x4xf32>
    %c0_21 = arith.constant 0 : index
    %c32 = arith.constant 32 : index
    %37 = vector.load %arg8[%c0_21, %c32] : memref<64x36xf32, #tpu.memory_space<vmem>>, vector<64x4xf32>
    tpu.vector_store %arg8[%c0_21, %c32], %36 {strides = array<i32>} : memref<64x36xf32, #tpu.memory_space<vmem>>, vector<64x4xf32>,
    %c0_22 = arith.constant 0 : index
    %c0_23 = arith.constant 0 : index
    %38 = vector.load %arg8[%c0_22, %c0_23] : memref<64x36xf32, #tpu.memory_space<vmem>>, vector<64x36xf32>
    %c0_24 = arith.constant 0 : index
    %c0_25 = arith.constant 0 : index
    %39 = vector.load %arg2[%c0_24, %c0_25] : memref<36x8xf32, #tpu.memory_space<vmem>>, vector<36x8xf32>
    %cst_26 = arith.constant dense<0.000000e+00> : vector<64x8xf32>
    %40 = tpu.matmul %38, %39, %cst_26 {dimension_numbers = #tpu.dot_dimension_numbers<[1], [0], [0], [1], [0, 0, 1, 1], [], []>} : vector<64x36xf32>, vector<36x8xf32>, vector<64x8xf32> -> vector<64x8xf32>
    %c0_27 = arith.constant 0 : index
    %c0_28 = arith.constant 0 : index
    %41 = vector.load %arg3[%c0_27, %c0_28] : memref<3x8xf32, #tpu.memory_space<vmem>>, vector<3x8xf32>
    %42 = vector.extract_strided_slice %41 {offsets = [0, 0], sizes = [1, 8], strides = [1, 1]} : vector<3x8xf32> to vector<1x8xf32>
    %43 = vector.broadcast %42 : vector<1x8xf32> to vector<64x8xf32>
    %44 = arith.addf %40, %43 : vector<64x8xf32>
    %45 = vector.shape_cast %44 : vector<64x8xf32> to vector<1x64x8xf32>
    %cst_29 = arith.constant dense<0.000000e+00> : vector<1xf32>
    %46 = vector.multi_reduction <add>, %45, %cst_29 [1, 2] : vector<1x64x8xf32> to vector<1xf32>
    %47 = vector.shape_cast %46 : vector<1xf32> to vector<1x1x1xf32>
    %48 = vector.extract %47[0, 0, 0] : f32 from vector<1x1x1xf32>
    %cst_30 = arith.constant 5.120000e+02 : f32
    %49 = arith.divf %48, %cst_30 : f32
    %50 = vector.broadcast %49 : f32 to vector<64x8xf32>
    %51 = arith.subf %44, %50 : vector<64x8xf32>
    %52 = arith.mulf %51, %51 : vector<64x8xf32>
    %53 = vector.shape_cast %52 : vector<64x8xf32> to vector<1x64x8xf32>
    %cst_31 = arith.constant dense<0.000000e+00> : vector<1xf32>
    %54 = vector.multi_reduction <add>, %53, %cst_31 [1, 2] : vector<1x64x8xf32> to vector<1xf32>
    %55 = vector.shape_cast %54 : vector<1xf32> to vector<1x1x1xf32>
    %56 = vector.extract %55[0, 0, 0] : f32 from vector<1x1x1xf32>
    %cst_32 = arith.constant 5.120000e+02 : f32
    %57 = arith.divf %56, %cst_32 : f32
    %58 = vector.broadcast %49 : f32 to vector<64x8xf32>
    %59 = arith.subf %44, %58 : vector<64x8xf32>
    %cst_33 = arith.constant 9.99999974E-6 : f32
    %60 = arith.addf %57, %cst_33 : f32
    %61 = math.rsqrt %60 : f32
    %62 = vector.broadcast %61 : f32 to vector<64x8xf32>
    %63 = arith.mulf %59, %62 : vector<64x8xf32>
    %64 = vector.extract_strided_slice %41 {offsets = [1, 0], sizes = [1, 8], strides = [1, 1]} : vector<3x8xf32> to vector<1x8xf32>
    %65 = vector.broadcast %64 : vector<1x8xf32> to vector<64x8xf32>
    %66 = arith.mulf %63, %65 : vector<64x8xf32>
    %67 = vector.extract_strided_slice %41 {offsets = [2, 0], sizes = [1, 8], strides = [1, 1]} : vector<3x8xf32> to vector<1x8xf32>
    %68 = vector.broadcast %67 : vector<1x8xf32> to vector<64x8xf32>
    %69 = arith.addf %66, %68 : vector<64x8xf32>
    %cst_34 = arith.constant 0.000000e+00 : f32
    %70 = vector.broadcast %cst_34 : f32 to vector<64x8xf32>
    %71 = arith.maximumf %69, %70 : vector<64x8xf32>
    %72 = vector.shape_cast %71 : vector<64x8xf32> to vector<8x8x8xf32>
    %cst_35 = arith.constant 0.000000e+00 : f32
    %73 = vector.broadcast %cst_35 : f32 to vector<10x10x8xf32>
    %c0_36 = arith.constant 0 : index
    %c0_37 = arith.constant 0 : index
    %c0_38 = arith.constant 0 : index
    %74 = vector.load %arg9[%c0_36, %c0_37, %c0_38] : memref<10x10x8xf32, #tpu.memory_space<vmem>>, vector<10x10x8xf32>
    tpu.vector_store %arg9[%c0_36, %c0_37, %c0_38], %73 {strides = array<i32>} : memref<10x10x8xf32, #tpu.memory_space<vmem>>, vector<10x10x8xf32>,
    %c1_39 = arith.constant 1 : index
    %c1_40 = arith.constant 1 : index
    %c0_41 = arith.constant 0 : index
    %75 = vector.load %arg9[%c1_39, %c1_40, %c0_41] : memref<10x10x8xf32, #tpu.memory_space<vmem>>, vector<8x8x8xf32>
    tpu.vector_store %arg9[%c1_39, %c1_40, %c0_41], %72 {strides = array<i32>} : memref<10x10x8xf32, #tpu.memory_space<vmem>>, vector<8x8x8xf32>,
    %c0_42 = arith.constant 0 : index
    %c0_43 = arith.constant 0 : index
    %c0_44 = arith.constant 0 : index
    %76 = vector.load %arg9[%c0_42, %c0_43, %c0_44] : memref<10x10x8xf32, #tpu.memory_space<vmem>>, vector<10x10x8xf32>
    %77 = vector.extract_strided_slice %76 {offsets = [0, 0, 0], sizes = [8, 8, 8], strides = [1, 1, 1]} : vector<10x10x8xf32> to vector<8x8x8xf32>
    %78 = vector.shape_cast %77 : vector<8x8x8xf32> to vector<64x8xf32>
    %c0_45 = arith.constant 0 : index
    %c0_46 = arith.constant 0 : index
    %79 = vector.load %arg10[%c0_45, %c0_46] : memref<64x72xf32, #tpu.memory_space<vmem>>, vector<64x8xf32>
    tpu.vector_store %arg10[%c0_45, %c0_46], %78 {strides = array<i32>} : memref<64x72xf32, #tpu.memory_space<vmem>>, vector<64x8xf32>,
    %80 = vector.extract_strided_slice %76 {offsets = [0, 1, 0], sizes = [8, 8, 8], strides = [1, 1, 1]} : vector<10x10x8xf32> to vector<8x8x8xf32>
    %81 = vector.shape_cast %80 : vector<8x8x8xf32> to vector<64x8xf32>
    %c0_47 = arith.constant 0 : index
    %c8_48 = arith.constant 8 : index
    %82 = vector.load %arg10[%c0_47, %c8_48] : memref<64x72xf32, #tpu.memory_space<vmem>>, vector<64x8xf32>
    tpu.vector_store %arg10[%c0_47, %c8_48], %81 {strides = array<i32>} : memref<64x72xf32, #tpu.memory_space<vmem>>, vector<64x8xf32>,
    %83 = vector.extract_strided_slice %76 {offsets = [0, 2, 0], sizes = [8, 8, 8], strides = [1, 1, 1]} : vector<10x10x8xf32> to vector<8x8x8xf32>
    %84 = vector.shape_cast %83 : vector<8x8x8xf32> to vector<64x8xf32>
    %c0_49 = arith.constant 0 : index
    %c16_50 = arith.constant 16 : index
    %85 = vector.load %arg10[%c0_49, %c16_50] : memref<64x72xf32, #tpu.memory_space<vmem>>, vector<64x8xf32>
    tpu.vector_store %arg10[%c0_49, %c16_50], %84 {strides = array<i32>} : memref<64x72xf32, #tpu.memory_space<vmem>>, vector<64x8xf32>,
    %86 = vector.extract_strided_slice %76 {offsets = [1, 0, 0], sizes = [8, 8, 8], strides = [1, 1, 1]} : vector<10x10x8xf32> to vector<8x8x8xf32>
    %87 = vector.shape_cast %86 : vector<8x8x8xf32> to vector<64x8xf32>
    %c0_51 = arith.constant 0 : index
    %c24_52 = arith.constant 24 : index
    %88 = vector.load %arg10[%c0_51, %c24_52] : memref<64x72xf32, #tpu.memory_space<vmem>>, vector<64x8xf32>
    tpu.vector_store %arg10[%c0_51, %c24_52], %87 {strides = array<i32>} : memref<64x72xf32, #tpu.memory_space<vmem>>, vector<64x8xf32>,
    %89 = vector.extract_strided_slice %76 {offsets = [1, 1, 0], sizes = [8, 8, 8], strides = [1, 1, 1]} : vector<10x10x8xf32> to vector<8x8x8xf32>
    %90 = vector.shape_cast %89 : vector<8x8x8xf32> to vector<64x8xf32>
    %c0_53 = arith.constant 0 : index
    %c32_54 = arith.constant 32 : index
    %91 = vector.load %arg10[%c0_53, %c32_54] : memref<64x72xf32, #tpu.memory_space<vmem>>, vector<64x8xf32>
    tpu.vector_store %arg10[%c0_53, %c32_54], %90 {strides = array<i32>} : memref<64x72xf32, #tpu.memory_space<vmem>>, vector<64x8xf32>,
    %92 = vector.extract_strided_slice %76 {offsets = [1, 2, 0], sizes = [8, 8, 8], strides = [1, 1, 1]} : vector<10x10x8xf32> to vector<8x8x8xf32>
    %93 = vector.shape_cast %92 : vector<8x8x8xf32> to vector<64x8xf32>
    %c0_55 = arith.constant 0 : index
    %c40 = arith.constant 40 : index
    %94 = vector.load %arg10[%c0_55, %c40] : memref<64x72xf32, #tpu.memory_space<vmem>>, vector<64x8xf32>
    tpu.vector_store %arg10[%c0_55, %c40], %93 {strides = array<i32>} : memref<64x72xf32, #tpu.memory_space<vmem>>, vector<64x8xf32>,
    %95 = vector.extract_strided_slice %76 {offsets = [2, 0, 0], sizes = [8, 8, 8], strides = [1, 1, 1]} : vector<10x10x8xf32> to vector<8x8x8xf32>
    %96 = vector.shape_cast %95 : vector<8x8x8xf32> to vector<64x8xf32>
    %c0_56 = arith.constant 0 : index
    %c48 = arith.constant 48 : index
    %97 = vector.load %arg10[%c0_56, %c48] : memref<64x72xf32, #tpu.memory_space<vmem>>, vector<64x8xf32>
    tpu.vector_store %arg10[%c0_56, %c48], %96 {strides = array<i32>} : memref<64x72xf32, #tpu.memory_space<vmem>>, vector<64x8xf32>,
    %98 = vector.extract_strided_slice %76 {offsets = [2, 1, 0], sizes = [8, 8, 8], strides = [1, 1, 1]} : vector<10x10x8xf32> to vector<8x8x8xf32>
    %99 = vector.shape_cast %98 : vector<8x8x8xf32> to vector<64x8xf32>
    %c0_57 = arith.constant 0 : index
    %c56 = arith.constant 56 : index
    %100 = vector.load %arg10[%c0_57, %c56] : memref<64x72xf32, #tpu.memory_space<vmem>>, vector<64x8xf32>
    tpu.vector_store %arg10[%c0_57, %c56], %99 {strides = array<i32>} : memref<64x72xf32, #tpu.memory_space<vmem>>, vector<64x8xf32>,
    %101 = vector.extract_strided_slice %76 {offsets = [2, 2, 0], sizes = [8, 8, 8], strides = [1, 1, 1]} : vector<10x10x8xf32> to vector<8x8x8xf32>
    %102 = vector.shape_cast %101 : vector<8x8x8xf32> to vector<64x8xf32>
    %c0_58 = arith.constant 0 : index
    %c64 = arith.constant 64 : index
    %103 = vector.load %arg10[%c0_58, %c64] : memref<64x72xf32, #tpu.memory_space<vmem>>, vector<64x8xf32>
    tpu.vector_store %arg10[%c0_58, %c64], %102 {strides = array<i32>} : memref<64x72xf32, #tpu.memory_space<vmem>>, vector<64x8xf32>,
    %c0_59 = arith.constant 0 : index
    %c0_60 = arith.constant 0 : index
    %104 = vector.load %arg10[%c0_59, %c0_60] : memref<64x72xf32, #tpu.memory_space<vmem>>, vector<64x72xf32>
    %c0_61 = arith.constant 0 : index
    %c0_62 = arith.constant 0 : index
    %105 = vector.load %arg4[%c0_61, %c0_62] : memref<72x8xf32, #tpu.memory_space<vmem>>, vector<72x8xf32>
    %cst_63 = arith.constant dense<0.000000e+00> : vector<64x8xf32>
    %106 = tpu.matmul %104, %105, %cst_63 {dimension_numbers = #tpu.dot_dimension_numbers<[1], [0], [0], [1], [0, 0, 1, 1], [], []>} : vector<64x72xf32>, vector<72x8xf32>, vector<64x8xf32> -> vector<64x8xf32>
    %c0_64 = arith.constant 0 : index
    %c0_65 = arith.constant 0 : index
    %107 = vector.load %arg5[%c0_64, %c0_65] : memref<3x8xf32, #tpu.memory_space<vmem>>, vector<3x8xf32>
    %108 = vector.extract_strided_slice %107 {offsets = [0, 0], sizes = [1, 8], strides = [1, 1]} : vector<3x8xf32> to vector<1x8xf32>
    %109 = vector.broadcast %108 : vector<1x8xf32> to vector<64x8xf32>
    %110 = arith.addf %106, %109 : vector<64x8xf32>
    %111 = vector.shape_cast %110 : vector<64x8xf32> to vector<1x64x8xf32>
    %cst_66 = arith.constant dense<0.000000e+00> : vector<1xf32>
    %112 = vector.multi_reduction <add>, %111, %cst_66 [1, 2] : vector<1x64x8xf32> to vector<1xf32>
    %113 = vector.shape_cast %112 : vector<1xf32> to vector<1x1x1xf32>
    %114 = vector.extract %113[0, 0, 0] : f32 from vector<1x1x1xf32>
    %cst_67 = arith.constant 5.120000e+02 : f32
    %115 = arith.divf %114, %cst_67 : f32
    %116 = vector.broadcast %115 : f32 to vector<64x8xf32>
    %117 = arith.subf %110, %116 : vector<64x8xf32>
    %118 = arith.mulf %117, %117 : vector<64x8xf32>
    %119 = vector.shape_cast %118 : vector<64x8xf32> to vector<1x64x8xf32>
    %cst_68 = arith.constant dense<0.000000e+00> : vector<1xf32>
    %120 = vector.multi_reduction <add>, %119, %cst_68 [1, 2] : vector<1x64x8xf32> to vector<1xf32>
    %121 = vector.shape_cast %120 : vector<1xf32> to vector<1x1x1xf32>
    %122 = vector.extract %121[0, 0, 0] : f32 from vector<1x1x1xf32>
    %cst_69 = arith.constant 5.120000e+02 : f32
    %123 = arith.divf %122, %cst_69 : f32
    %124 = vector.broadcast %115 : f32 to vector<64x8xf32>
    %125 = arith.subf %110, %124 : vector<64x8xf32>
    %cst_70 = arith.constant 9.99999974E-6 : f32
    %126 = arith.addf %123, %cst_70 : f32
    %127 = math.rsqrt %126 : f32
    %128 = vector.broadcast %127 : f32 to vector<64x8xf32>
    %129 = arith.mulf %125, %128 : vector<64x8xf32>
    %130 = vector.extract_strided_slice %107 {offsets = [1, 0], sizes = [1, 8], strides = [1, 1]} : vector<3x8xf32> to vector<1x8xf32>
    %131 = vector.broadcast %130 : vector<1x8xf32> to vector<64x8xf32>
    %132 = arith.mulf %129, %131 : vector<64x8xf32>
    %133 = vector.extract_strided_slice %107 {offsets = [2, 0], sizes = [1, 8], strides = [1, 1]} : vector<3x8xf32> to vector<1x8xf32>
    %134 = vector.broadcast %133 : vector<1x8xf32> to vector<64x8xf32>
    %135 = arith.addf %132, %134 : vector<64x8xf32>
    %cst_71 = arith.constant 0.000000e+00 : f32
    %136 = vector.broadcast %cst_71 : f32 to vector<64x8xf32>
    %137 = arith.maximumf %135, %136 : vector<64x8xf32>
    %138 = vector.shape_cast %137 : vector<64x8xf32> to vector<1x8x8x8xf32>
    %c0_72 = arith.constant 0 : index
    %c0_73 = arith.constant 0 : index
    %c0_74 = arith.constant 0 : index
    %c0_75 = arith.constant 0 : index
    %139 = vector.load %arg6[%c0_72, %c0_73, %c0_74, %c0_75] : memref<1x8x8x8xf32, #tpu.memory_space<vmem>>, vector<1x8x8x8xf32>
    tpu.vector_store %arg6[%c0_72, %c0_73, %c0_74, %c0_75], %138 {strides = array<i32>} : memref<1x8x8x8xf32, #tpu.memory_space<vmem>>, vector<1x8x8x8xf32>,
    return
  }
  func.func @transform_0(%arg0: i32) -> (i32, i32, i32, i32) {
    %c0_i32 = arith.constant 0 : i32
    %c0_i32_0 = arith.constant 0 : i32
    %c0_i32_1 = arith.constant 0 : i32
    %c0_i32_2 = arith.constant 0 : i32
    return %arg0, %c0_i32, %c0_i32_0, %c0_i32_1 : i32, i32, i32, i32
  }
  func.func @transform_1(%arg0: i32) -> (i32, i32) {
    %c0_i32 = arith.constant 0 : i32
    %c0_i32_0 = arith.constant 0 : i32
    %c0_i32_1 = arith.constant 0 : i32
    return %c0_i32, %c0_i32_0 : i32, i32
  }
  func.func @transform_2(%arg0: i32) -> (i32, i32) {
    %c0_i32 = arith.constant 0 : i32
    %c0_i32_0 = arith.constant 0 : i32
    %c0_i32_1 = arith.constant 0 : i32
    return %c0_i32, %c0_i32_0 : i32, i32
  }
  func.func @transform_3(%arg0: i32) -> (i32, i32) {
    %c0_i32 = arith.constant 0 : i32
    %c0_i32_0 = arith.constant 0 : i32
    %c0_i32_1 = arith.constant 0 : i32
    return %c0_i32, %c0_i32_0 : i32, i32
  }
  func.func @transform_4(%arg0: i32) -> (i32, i32) {
    %c0_i32 = arith.constant 0 : i32
    %c0_i32_0 = arith.constant 0 : i32
    %c0_i32_1 = arith.constant 0 : i32
    return %c0_i32, %c0_i32_0 : i32, i32
  }
  func.func @transform_5(%arg0: i32) -> (i32, i32, i32, i32) {
    %c0_i32 = arith.constant 0 : i32
    %c0_i32_0 = arith.constant 0 : i32
    %c0_i32_1 = arith.constant 0 : i32
    %c0_i32_2 = arith.constant 0 : i32
    return %arg0, %c0_i32, %c0_i32_0, %c0_i32_1 : i32, i32, i32, i32
  }
}

</mosaic_0001>

<bundles_post_ra>
// kernel: down_pallas.1
= control target key start
LH: loop header
LB: loop body
LE: loop exit
PB: predicated region body
PF: predicated region fallthrough
CT: control target
= control target key end

     0   :  { %s1938_s18 = smov 0   ;;  %s2748_s0 = inlined_call_operand.vmem [shape: f32[2,16,8,8], index: 0, kind: input, shape index: {}]   ;;  %s2749_s1 = inlined_call_operand.vmem [shape: f32[36,8], index: 1, kind: input, shape index: {}]   ;;  %s2750_s2 = inlined_call_operand.vmem [shape: f32[3,8], index: 2, kind: input, shape index: {}]   ;;  %s2751_s3 = inlined_call_operand.vmem [shape: f32[72,8], index: 3, kind: input, shape index: {}]   ;;  %s2752_s4 = inlined_call_operand.vmem [shape: f32[3,8], index: 4, kind: input, shape index: {}]   ;;  %s2753_s5 = inlined_call_operand.vmem [shape: f32[2,8,8,8], index: 5, kind: output, shape index: {}]  }
   0x1 LB: > { %s1712_s19 = sadd.s32 4294967295, %s1892_s18   ;;  %p1716_p0 = scmp.ge.s32.totalorder %s1892_s18, 1  ;;  %s1892_s18 = sphi %s1938_s18, %s15_s18  }
   0x2   : > { %p187_p1 = scmp.lt.s32.totalorder %s1892_s18, 3 }
   0x4   : > { %p188_p2 = pnand %p1716_p0, %p187_p1 }
   0x5   : > { %p1948_p3 = scmp.lt.s32.totalorder (!%p188_p2), %s1712_s19, 1  ;;  %vm241_vm0 = vcmask (!%p188_p2), 64512   ;;  %vm306_vm1 = vcmask (!%p188_p2), 31744   ;;  %vm308_vm2 = vcmask (!%p188_p2), 25600   ;;  %v1894_v0 = vmov (!%p188_p2), 0.0   ;;  %s1895_s25 = smov (!%p188_p2), 124  }
   0x6   : > { %191 = sbr.rel (%p188_p2) target bundleno = 2090 (0x82a), region = 40  ;;  %310 = vst.msk [vmem:[#allocation2 + $0x10] sm:$0xff] (!%p188_p2), %vm306_vm1, %v1894_v0  ;;  %307 = vst.msk [vmem:[#allocation2] sm:$0xff] (!%p188_p2), %vm306_vm1, %v1894_v0  ;;  %vm381_vm3 = vcmask (!%p188_p2), 1046528   ;;  %vm439_vm4 = vcmask (!%p188_p2), 1045504   ;;  %s1896_s26 = smov (!%p188_p2), 4  }
   0x7   : > { %311 = vst.msk [vmem:[#allocation2 + $0x18] sm:$0x3] (!%p188_p2), %vm308_vm2, %v1894_v0  ;;  %309 = vst.msk [vmem:[#allocation2 + $0x8] sm:$0x3] (!%p188_p2), %vm308_vm2, %v1894_v0  ;;  %s1897_s27 = smov (!%p188_p2), 24   ;;  %s1898_s28 = smov (!%p188_p2), 8  }
   0x8   : > { %312 = vst.msk [vmem:[#allocation2 + $0x20] sm:$0xff] (!%p188_p2), %vm306_vm1, %v1894_v0  ;;  %314 = vst.msk [vmem:[#allocation2 + $0x30] sm:$0xff] (!%p188_p2), %vm306_vm1, %v1894_v0  ;;  %s1899_s29 = smov (!%p188_p2), 28   ;;  %s1900_s30 = smov (!%p188_p2), 12   ;;  %vm430_vm5 = vcmask (!%p188_p2), 64544   ;;  %vm488_vm6 = vcmask (!%p188_p2), 97344  }
   0x9   : > { %313 = vst.msk [vmem:[#allocation2 + $0x28] sm:$0x3] (!%p188_p2), %vm308_vm2, %v1894_v0  ;;  %315 = vst.msk [vmem:[#allocation2 + $0x38] sm:$0x3] (!%p188_p2), %vm308_vm2, %v1894_v0  ;;  %s1901_s6 = smov (!%p188_p2), 16   ;;  %s1902_s7 = smov (!%p188_p2), 20  }
   0xa   : > { %316 = vst.msk [vmem:[#allocation2 + $0x40] sm:$0xff] (!%p188_p2), %vm306_vm1, %v1894_v0  ;;  %318 = vst.msk [vmem:[#allocation2 + $0x50] sm:$0xff] (!%p188_p2), %vm306_vm1, %v1894_v0  ;;  %s1903_s16 = smov (!%p188_p2), 32   ;;  %vm754_vm7 = vcmask (!%p188_p2), 1043456   ;;  %vm522_vm8 = vcmask (!%p188_p2), 130144   ;;  %vm559_vm9 = vcmask (!%p188_p2), 162944  }
   0xb   : > { %317 = vst.msk [vmem:[#allocation2 + $0x48] sm:$0x3] (!%p188_p2), %vm308_vm2, %v1894_v0  ;;  %319 = vst.msk [vmem:[#allocation2 + $0x58] sm:$0x3] (!%p188_p2), %vm308_vm2, %v1894_v0  ;;  %vm595_vm10 = vcmask (!%p188_p2), 195744   ;;  %vm629_vm11 = vcmask (!%p188_p2), 228544  }
   0xc   : > { %320 = vst.msk [vmem:[#allocation2 + $0x60] sm:$0xff] (!%p188_p2), %vm306_vm1, %v1894_v0  ;;  %322 = vst.msk [vmem:[#allocation2 + $0x70] sm:$0xff] (!%p188_p2), %vm306_vm1, %v1894_v0  ;;  %vm666_vm12 = vcmask (!%p188_p2), 261344   ;;  %vm702_vm13 = vcmask (!%p188_p2), 294144   ;;  %vm729_vm14 = vcmask (!%p188_p2), 293888   ;;  %vm980_vm15 = vcmask (!%p188_p2), 58368  }
   0xd   : > { %321 = vst.msk [vmem:[#allocation2 + $0x68] sm:$0x3] %vm308_vm2, %v1894_v0  ;;  %323 = vst.msk [vmem:[#allocation2 + $0x78] sm:$0x3] %vm308_vm2, %v1894_v0  ;;  %s2756_s19 = smov (!%p1948_p3, %s1712_s19), 1  ;;  %v337_v27 = vld [vmem:[#allocation2] sm:$0xff] }
   0xe   : > { %324 = vst.msk [vmem:[#allocation2 + $0x80] sm:$0xff] %vm306_vm1, %v1894_v0  ;;  %326 = vst.msk [vmem:[#allocation2 + $0x90] sm:$0xff] %vm306_vm1, %v1894_v0  ;;  %s1740_s21 = sshll.u32 %s2756_s19, 7  ;;  %v338_v40 = vld [vmem:[#allocation2 + $0x8] sm:$0x3]  ;;  %v382_v43 = vrot.slane %v337_v27, 1 }
   0xf   : > { %325 = vst.msk [vmem:[#allocation2 + $0x88] sm:$0x3] %vm308_vm2, %v1894_v0  ;;  %327 = vst.msk [vmem:[#allocation2 + $0x98] sm:$0x3] %vm308_vm2, %v1894_v0  ;;  %s2022_s24 = scalar_lea.vmem %s2748_s0, %s1740_s21  ;;  %v383_v44 = vrot.slane %v338_v40, 1  ;;  %v440_v48 = vrot.slane %v337_v27, 2 }
  0x10   : > { %979 = vst.msk [vmem:[#allocation4] sm:$0xff] %vm241_vm0, %v1894_v0  ;;  %982 = vst.msk [vmem:[#allocation4 + $0x10] sm:$0xff] %vm241_vm0, %v1894_v0  ;;  %v225_v1 = vld [vmem:[%s2022_s24] sm:$0xff]  ;;  %v226_v2 = vld [vmem:[%s2022_s24 + $0x8] sm:$0xff]  ;;  %v441_v49 = vrot.slane %v338_v40, 2  ;;  %vm1158_vm2 = vcmask 195712  }
  0x11   : > { %984 = vst.msk [vmem:[#allocation4 + $0x20] sm:$0xff] %vm241_vm0, %v1894_v0  ;;  %986 = vst.msk [vmem:[#allocation4 + $0x30] sm:$0xff] %vm241_vm0, %v1894_v0  ;;  %v229_v3 = vld [vmem:[%s2022_s24 + $0x20] sm:$0xff]  ;;  %v242_v4 = vsel %vm241_vm0, %v225_v1, -inf  ;;  %v243_v5 = vsel %vm241_vm0, %v226_v2, -inf  ;;  %v230_v6 = vld [vmem:[%s2022_s24 + $0x28] sm:$0xff]  ;;  %v384_v47 = vsel %vm381_vm3, %v382_v43, %v383_v44 }
  0x12   : > { %988 = vst.msk [vmem:[#allocation4 + $0x40] sm:$0xff] %vm241_vm0, %v1894_v0  ;;  %990 = vst.msk [vmem:[#allocation4 + $0x50] sm:$0xff] %vm241_vm0, %v1894_v0  ;;  %v248_v7 = vsel %vm241_vm0, %v229_v3, -inf  ;;  %v227_v8 = vld [vmem:[%s2022_s24 + $0x10] sm:$0xff]  ;;  %v228_v9 = vld [vmem:[%s2022_s24 + $0x18] sm:$0xff]  ;;  %v2033_v10 = vmax.f32 %v242_v4, %v243_v5  ;;  %v249_v11 = vsel %vm241_vm0, %v230_v6, -inf  ;;  %v442_v52 = vsel %vm439_vm4, %v440_v48, %v441_v49 }
  0x13   : > { %992 = vst.msk [vmem:[#allocation4 + $0x60] sm:$0xff] %vm241_vm0, %v1894_v0  ;;  %994 = vst.msk [vmem:[#allocation4 + $0x70] sm:$0xff] %vm241_vm0, %v1894_v0  ;;  %v245_v12 = vsel %vm241_vm0, %v227_v8, -inf  ;;  %v246_v13 = vsel %vm241_vm0, %v228_v9, -inf  ;;  %v231_v14 = vld [vmem:[%s2022_s24 + $0x30] sm:$0xff]  ;;  %v232_v15 = vld [vmem:[%s2022_s24 + $0x38] sm:$0xff]  ;;  %v2041_v17 = vmax.f32 %v248_v7, %v249_v11 }
  0x14   : > { %996 = vst.msk [vmem:[#allocation4 + $0x80] sm:$0xff] %vm241_vm0, %v1894_v0  ;;  %998 = vst.msk [vmem:[#allocation4 + $0x90] sm:$0xff] %vm241_vm0, %v1894_v0  ;;  %v233_v16 = vld [vmem:[%s2022_s24 + $0x40] sm:$0xff]  ;;  %v251_v18 = vsel %vm241_vm0, %v231_v14, -inf  ;;  %v252_v19 = vsel %vm241_vm0, %v232_v15, -inf  ;;  %v234_v20 = vld [vmem:[%s2022_s24 + $0x48] sm:$0xff]  ;;  %274 = vrot.lane.b32.xlu0 %v2033_v10, %s1895_s25  ;;  %v247_v23 = vmax.f32 %v245_v12, %v246_v13 }
  0x15   : > { %v235_v21 = vld [vmem:[%s2022_s24 + $0x50] sm:$0xff]  ;;  %v236_v22 = vld [vmem:[%s2022_s24 + $0x58] sm:$0xff]  ;;  %278 = vrot.lane.b32.xlu1 %v2041_v17, %s1895_s25  ;;  %v253_v24 = vmax.f32 %v251_v18, %v252_v19  ;;  %v254_v25 = vsel %vm241_vm0, %v233_v16, -inf  ;;  %v255_v26 = vsel %vm241_vm0, %v234_v20, -inf  ;;  %v237_v30 = vld [vmem:[%s2022_s24 + $0x60] sm:$0xff]  ;;  %357 = vst.msk [vmem:[#allocation3] sm:$0xff] %vm306_vm1, %v337_v27 }
  0x16   : > { %v257_v28 = vsel %vm241_vm0, %v235_v21, -inf  ;;  %v258_v29 = vsel %vm241_vm0, %v236_v22, -inf  ;;  %v238_v31 = vld [vmem:[%s2022_s24 + $0x68] sm:$0xff]  ;;  %v239_v32 = vld [vmem:[%s2022_s24 + $0x70] sm:$0xff]  ;;  %v240_v33 = vld [vmem:[%s2022_s24 + $0x78] sm:$0xff]  ;;  %v256_v34 = vmax.f32 %v254_v25, %v255_v26  ;;  %v260_v36 = vsel %vm241_vm0, %v237_v30, -inf }
  0x17   : > { %v259_v35 = vmax.f32 %v257_v28, %v258_v29  ;;  %v261_v37 = vsel %vm241_vm0, %v238_v31, -inf  ;;  %v263_v38 = vsel %vm241_vm0, %v239_v32, -inf  ;;  %v264_v39 = vsel %vm241_vm0, %v240_v33, -inf  ;;  %v2069_v45 = vld [vmem:[#allocation2 + $0x90] sm:$0xff]  ;;  %v2071_v46 = vld [vmem:[#allocation2 + $0x98] sm:$0x3] }
  0x18   : > { %276 = vrot.lane.b32.xlu0 %v247_v23, %s1895_s25  ;;  %v262_v41 = vmax.f32 %v260_v36, %v261_v37  ;;  %v265_v42 = vmax.f32 %v263_v38, %v264_v39  ;;  %v639_v50 = vrot.slane %v2069_v45, 1  ;;  %v640_v51 = vrot.slane %v2071_v46, 1  ;;  %v722_v48 = vld [vmem:[%s2749_s1 + $0x18] sm:$0xff]  ;;  %983 = vst.msk [vmem:[#allocation4 + $0x18] sm:$0x3] %vm980_vm15, %v1894_v0  ;;  %s1906_s12 = smov 40  }
  0x19   : > { %280 = vrot.lane.b32.xlu1 %v253_v24, %s1895_s25  ;;  %985 = vst.msk [vmem:[#allocation4 + $0x28] sm:$0x3] %vm980_vm15, %v1894_v0  ;;  %987 = vst.msk [vmem:[#allocation4 + $0x38] sm:$0x3] %vm980_vm15, %v1894_v0  ;;  %s1741_s13 = sshll.u32 %s2756_s19, 6 }
  0x1a   : > { %v641_v53 = vsel %vm381_vm3, %v639_v50, %v640_v51  ;;  %989 = vst.msk [vmem:[#allocation4 + $0x48] sm:$0x3] %vm980_vm15, %v1894_v0  ;;  %991 = vst.msk [vmem:[#allocation4 + $0x58] sm:$0x3] %vm980_vm15, %v1894_v0  ;;  %s224_s17 = scalar_lea.vmem %s2753_s5, %s1741_s13 }
  0x1b   : > { %993 = vst.msk [vmem:[#allocation4 + $0x68] sm:$0x3] %vm980_vm15, %v1894_v0  ;;  %995 = vst.msk [vmem:[#allocation4 + $0x78] sm:$0x3] %vm980_vm15, %v1894_v0 }
  0x1c   : > { %282 = vrot.lane.b32.xlu0 %v256_v34, %s1895_s25  ;;  %997 = vst.msk [vmem:[#allocation4 + $0x88] sm:$0x3] %vm980_vm15, %v1894_v0  ;;  %981 = vst.msk [vmem:[#allocation4 + $0x8] sm:$0x3] %vm980_vm15, %v1894_v0 }
  0x1d   : > { %284 = vrot.lane.b32.xlu1 %v259_v35, %s1895_s25  ;;  %999 = vst.msk [vmem:[#allocation4 + $0x98] sm:$0x3] %vm980_vm15, %v1894_v0 }
  0x20   : > { %286 = vrot.lane.b32.xlu0 %v262_v41, %s1895_s25 }
  0x21   : > { %288 = vrot.lane.b32.xlu1 %v265_v42, %s1895_s25  ;;  %s1904_s25 = smov 48  }
  0x24   : > { %406 = vrot.lane.b32.xlu0 %v384_v47, %s1896_s26  ;;  %v721_v47 = vld [vmem:[%s2749_s1 + $0x10] sm:$0xff] }
  0x25   : > { %619 = vrot.lane.b32.xlu1 %v2069_v45, %s1897_s27  ;;  %v1828_v50 = vpack.c.bf16 %v722_v48, %v721_v47 }
  0x28   : > { %464 = vrot.lane.b32.xlu0 %v442_v52, %s1898_s28 }
  0x29   : > { %656 = vrot.lane.b32.xlu1 %v641_v53, %s1899_s29  ;;  %v723_v53 = vld [vmem:[%s2749_s1 + $0x20] sm:$0xf] }
  0x86   : > { %v275_v54 = vpop.permute.xlu0 %274 }
  0x87   : > { %v298_v55 = vmax.f32 %v2033_v10, %v275_v54  ;;  %v279_v56 = vpop.permute.xlu1 %278 }
  0x88   : > { %v300_v57 = vmax.f32 %v2041_v17, %v279_v56 }
  0x89   : > { %329 = vst.msk [vmem:[#allocation2 + $0x11] sm:$0xff] %vm306_vm1, %v298_v55 }
  0x8a   : > { %331 = vst.msk [vmem:[#allocation2 + $0x31] sm:$0xff] %vm306_vm1, %v300_v57  ;;  %v277_v58 = vpop.permute.xlu0 %276 }
  0x8b   : > { %v299_v59 = vmax.f32 %v247_v23, %v277_v58  ;;  %v281_v60 = vpop.permute.xlu1 %280 }
  0x8c   : > { %v301_v61 = vmax.f32 %v253_v24, %v281_v60 }
  0x8d   : > { %330 = vst.msk [vmem:[#allocation2 + $0x21] sm:$0xff] %vm306_vm1, %v299_v59 }
  0x8e   : > { %332 = vst.msk [vmem:[#allocation2 + $0x41] sm:$0xff] %vm306_vm1, %v301_v61  ;;  %v283_v62 = vpop.permute.xlu0 %282 }
  0x8f   : > { %v302_v63 = vmax.f32 %v256_v34, %v283_v62  ;;  %v285_v1 = vpop.permute.xlu1 %284 }
  0x90   : > { %v339_v2 = vld [vmem:[#allocation2 + $0x10] sm:$0xff]  ;;  %v303_v3 = vmax.f32 %v259_v35, %v285_v1  ;;  %v340_v17 = vld [vmem:[#allocation2 + $0x18] sm:$0x3] }
  0x91   : > { %498 = vrot.lane.b32.xlu0 %v339_v2, %s1900_s30  ;;  %358 = vst.msk [vmem:[#allocation3 + $0x8] sm:$0xff] %vm306_vm1, %v339_v2  ;;  %333 = vst.msk [vmem:[#allocation2 + $0x51] sm:$0xff] %vm306_vm1, %v302_v63  ;;  %v2094_v4 = vld [vmem:[#allocation2 + $0x30] sm:$0xff]  ;;  %v385_v18 = vrot.slane %v339_v2, 1  ;;  %v386_v19 = vrot.slane %v340_v17, 1  ;;  %v443_v21 = vrot.slane %v339_v2, 2 }
  0x92   : > { %360 = vst.msk [vmem:[#allocation3 + $0x18] sm:$0xff] %vm306_vm1, %v2094_v4  ;;  %334 = vst.msk [vmem:[#allocation2 + $0x61] sm:$0xff] %vm306_vm1, %v303_v3  ;;  %v287_v5 = vpop.permute.xlu0 %286  ;;  %v444_v25 = vrot.slane %v340_v17, 2  ;;  %v344_v26 = vld [vmem:[#allocation2 + $0x38] sm:$0x3]  ;;  %v391_v29 = vrot.slane %v2094_v4, 1 }
  0x93   : > { %v304_v6 = vmax.f32 %v262_v41, %v287_v5  ;;  %v289_v7 = vpop.permute.xlu1 %288  ;;  %v387_v22 = vsel %vm381_vm3, %v385_v18, %v386_v19  ;;  %v392_v30 = vrot.slane %v344_v26, 1  ;;  %v449_v35 = vrot.slane %v2094_v4, 2  ;;  %v719_v41 = vld [vmem:[%s2749_s1] sm:$0xff] }
  0x94   : > { %v341_v8 = vld [vmem:[#allocation2 + $0x20] sm:$0xff]  ;;  %v305_v9 = vmax.f32 %v265_v42, %v289_v7  ;;  %v342_v20 = vld [vmem:[#allocation2 + $0x28] sm:$0x3]  ;;  %v445_v28 = vsel %vm439_vm4, %v443_v21, %v444_v25  ;;  %v450_v36 = vrot.slane %v344_v26, 2  ;;  %v675_v21 = vrot.slane %v2069_v45, 2 }
  0x95   : > { %607 = vrot.lane.b32.xlu0 %v2094_v4, %s1897_s27  ;;  %500 = vrot.lane.b32.xlu1 %v341_v8, %s1900_s30  ;;  %359 = vst.msk [vmem:[#allocation3 + $0x10] sm:$0xff] %vm306_vm1, %v341_v8  ;;  %v2103_v10 = vld [vmem:[#allocation2 + $0x40] sm:$0xff]  ;;  %335 = vst.msk [vmem:[#allocation2 + $0x71] sm:$0xff] %vm306_vm1, %v304_v6  ;;  %v388_v23 = vrot.slane %v341_v8, 1  ;;  %v389_v24 = vrot.slane %v342_v20, 1  ;;  %v393_v31 = vsel %vm381_vm3, %v391_v29, %v392_v30  ;;  %v446_v32 = vrot.slane %v341_v8, 2 }
  0x96   : > { %361 = vst.msk [vmem:[#allocation3 + $0x20] sm:$0xff] %vm306_vm1, %v2103_v10  ;;  %336 = vst.msk [vmem:[#allocation2 + $0x81] sm:$0xff] %vm306_vm1, %v305_v9  ;;  %v407_v11 = vpop.permute.xlu0 %406  ;;  %v447_v33 = vrot.slane %v342_v20, 2  ;;  %v451_v37 = vsel %vm439_vm4, %v449_v35, %v450_v36  ;;  %v346_v38 = vld [vmem:[#allocation2 + $0x48] sm:$0x3]  ;;  %v394_v39 = vrot.slane %v2103_v10, 1 }
  0x97   : > { %431 = vst.msk [vmem:[#allocation3] sm:$0xff] %vm430_vm5, %v407_v11  ;;  %v390_v27 = vsel %vm381_vm3, %v388_v23, %v389_v24  ;;  %v395_v40 = vrot.slane %v346_v38, 1  ;;  %v720_v42 = vld [vmem:[%s2749_s1 + $0x8] sm:$0xff]  ;;  %v452_v55 = vrot.slane %v2103_v10, 2  ;;  %v453_v56 = vrot.slane %v346_v38, 2  ;;  %v2227_v17 = vpop.permute.xlu1 %619 }
  0x98   : > { %v2110_v12 = vld [vmem:[#allocation2 + $0x50] sm:$0xff]  ;;  %v448_v34 = vsel %vm439_vm4, %v446_v32, %v447_v33  ;;  %v1824_v43 = vpack.c.bf16 %v720_v42, %v719_v41  ;;  %v348_v49 = vld [vmem:[#allocation2 + $0x58] sm:$0x3] }
  0x99   : > { %504 = vrot.lane.b32.xlu0 %v2103_v10, %s1900_s30  ;;  %605 = vrot.lane.b32.xlu1 %v341_v8, %s1897_s27  ;;  %362 = vst.msk [vmem:[#allocation3 + $0x28] sm:$0xff] %vm306_vm1, %v2110_v12  ;;  %v2117_v13 = vld [vmem:[#allocation2 + $0x60] sm:$0xff]  ;;  %v396_v44 = vsel %vm381_vm3, %v394_v39, %v395_v40  ;;  %v397_v51 = vrot.slane %v2110_v12, 1  ;;  %v398_v52 = vrot.slane %v348_v49, 1  ;;  %v454_v57 = vsel %vm439_vm4, %v452_v55, %v453_v56  ;;  %v350_v61 = vld [vmem:[#allocation2 + $0x68] sm:$0x3] }
  0x9a   : > { %363 = vst.msk [vmem:[#allocation3 + $0x30] sm:$0xff] %vm306_vm1, %v2117_v13  ;;  %v465_v14 = vpop.permute.xlu0 %464  ;;  %1825 = vmatprep.subr.bf16.mxu0 %v1824_v43  ;;  %v455_v58 = vrot.slane %v2110_v12, 2  ;;  %v456_v59 = vrot.slane %v348_v49, 2  ;;  %v400_v62 = vrot.slane %v2117_v13, 1  ;;  %v401_v63 = vrot.slane %v350_v61, 1 }
  0x9b   : > { %489 = vst.msk [vmem:[#allocation3] sm:$0xff] %vm488_vm6, %v465_v14  ;;  %1827 = vmatpush3.bf16.msra.mxu0 %v1824_v43  ;;  %v399_v54 = vsel %vm381_vm3, %v397_v51, %v398_v52  ;;  %v458_v6 = vrot.slane %v2117_v13, 2  ;;  %v459_v7 = vrot.slane %v350_v61, 2  ;;  %v2234_v20 = vpop.permute.xlu1 %656 }
  0x9c   : > { %v2122_v15 = vld [vmem:[#allocation2 + $0x70] sm:$0xff]  ;;  %1829 = vmatprep.subr.bf16.mxu0 %v1828_v50  ;;  %v457_v60 = vsel %vm439_vm4, %v455_v58, %v456_v59  ;;  %v402_v1 = vsel %vm381_vm3, %v400_v62, %v401_v63  ;;  %v352_v2 = vld [vmem:[#allocation2 + $0x78] sm:$0x3] }
  0x9d   : > { %502 = vrot.lane.b32.xlu1 %v2094_v4, %s1900_s30  ;;  %611 = vrot.lane.b32.xlu0 %v2110_v12, %s1897_s27  ;;  %364 = vst.msk [vmem:[#allocation3 + $0x38] sm:$0xff] %vm306_vm1, %v2122_v15  ;;  %v2138_v16 = vld [vmem:[#allocation2 + $0x80] sm:$0xff]  ;;  %v403_v3 = vrot.slane %v2122_v15, 1  ;;  %v404_v4 = vrot.slane %v352_v2, 1  ;;  %v460_v8 = vsel %vm439_vm4, %v458_v6, %v459_v7  ;;  %v461_v9 = vrot.slane %v2122_v15, 2 }
  0x9e   : > { %v568_v18 = vrot.slane %v2138_v16, 2  ;;  %vm1101_vm1 = vcmask 130112  }
  0x9f   : > { %1831 = vmatpush3.bf16.msra.mxu0 %v1828_v50  ;;  %v405_v5 = vsel %vm381_vm3, %v403_v3, %v404_v4 }
  0xa0   : > { %1780 = vmatprep.subr.msk.mxu0 %vm754_vm7, %v723_v53 }
  0xa1   : > { %609 = vrot.lane.b32.xlu1 %v2103_v10, %s1897_s27  ;;  %508 = vrot.lane.b32.xlu0 %v2117_v13, %s1900_s30  ;;  %v462_v10 = vrot.slane %v352_v2, 2 }
  0xa3   : > { %1781 = vmatpush3.msk.msra.mxu0 %vm754_vm7, %v723_v53  ;;  %v463_v11 = vsel %vm439_vm4, %v461_v9, %v462_v10  ;;  %vm1336_vm7 = vcmask 523712  }
  0xa5   : > { %506 = vrot.lane.b32.xlu1 %v2110_v12, %s1900_s30  ;;  %615 = vrot.lane.b32.xlu0 %v2122_v15, %s1897_s27  ;;  %v354_v12 = vld [vmem:[#allocation2 + $0x88] sm:$0x3] }
  0xa6   : > { %v533_v14 = vrot.slane %v354_v12, 1  ;;  %v569_v19 = vrot.slane %v354_v12, 2 }
  0xa8   : > { %v570_v24 = vsel %vm439_vm4, %v568_v18, %v569_v19 }
  0xa9   : > { %613 = vrot.lane.b32.xlu1 %v2117_v13, %s1897_s27  ;;  %512 = vrot.lane.b32.xlu0 %v2138_v16, %s1900_s30  ;;  %v532_v13 = vrot.slane %v2138_v16, 1 }
  0xad   : > { %617 = vrot.lane.b32.xlu0 %v2138_v16, %s1897_s27  ;;  %510 = vrot.lane.b32.xlu1 %v2122_v15, %s1900_s30  ;;  %v534_v15 = vsel %vm381_vm3, %v532_v13, %v533_v14 }
  0xb1   : > { %535 = vrot.lane.b32.xlu0 %v387_v22, %s1901_s6  ;;  %408 = vrot.lane.b32.xlu1 %v387_v22, %s1896_s26  ;;  %v676_v22 = vrot.slane %v2071_v46, 2 }
  0xb3   : > { %v677_v16 = vsel %vm439_vm4, %v675_v21, %v676_v22 }
  0xb5   : > { %537 = vrot.lane.b32.xlu0 %v390_v27, %s1901_s6  ;;  %466 = vrot.lane.b32.xlu1 %v445_v28, %s1898_s28 }
  0xb9   : > { %412 = vrot.lane.b32.xlu0 %v393_v31, %s1896_s26  ;;  %410 = vrot.lane.b32.xlu1 %v390_v27, %s1896_s26 }
  0xbd   : > { %573 = vrot.lane.b32.xlu0 %v448_v34, %s1902_s7  ;;  %571 = vrot.lane.b32.xlu1 %v445_v28, %s1902_s7 }
  0xc1   : > { %470 = vrot.lane.b32.xlu0 %v451_v37, %s1898_s28  ;;  %468 = vrot.lane.b32.xlu1 %v448_v34, %s1898_s28 }
  0xc5   : > { %644 = vrot.lane.b32.xlu0 %v393_v31, %s1899_s29  ;;  %642 = vrot.lane.b32.xlu1 %v390_v27, %s1899_s29 }
  0xc9   : > { %414 = vrot.lane.b32.xlu0 %v396_v44, %s1896_s26  ;;  %539 = vrot.lane.b32.xlu1 %v393_v31, %s1901_s6 }
  0xcd   : > { %575 = vrot.lane.b32.xlu0 %v451_v37, %s1902_s7  ;;  %678 = vrot.lane.b32.xlu1 %v448_v34, %s1903_s16 }
  0xd1   : > { %416 = vrot.lane.b32.xlu0 %v399_v54, %s1896_s26  ;;  %541 = vrot.lane.b32.xlu1 %v396_v44, %s1901_s6 }
  0xd5   : > { %577 = vrot.lane.b32.xlu0 %v454_v57, %s1902_s7  ;;  %680 = vrot.lane.b32.xlu1 %v451_v37, %s1903_s16 }
  0xd9   : > { %474 = vrot.lane.b32.xlu0 %v457_v60, %s1898_s28  ;;  %472 = vrot.lane.b32.xlu1 %v454_v57, %s1898_s28 }
  0xdd   : > { %648 = vrot.lane.b32.xlu0 %v399_v54, %s1899_s29  ;;  %646 = vrot.lane.b32.xlu1 %v396_v44, %s1899_s29 }
  0xe1   : > { %418 = vrot.lane.b32.xlu0 %v402_v1, %s1896_s26  ;;  %543 = vrot.lane.b32.xlu1 %v399_v54, %s1901_s6 }
  0xe5   : > { %579 = vrot.lane.b32.xlu0 %v457_v60, %s1902_s7  ;;  %682 = vrot.lane.b32.xlu1 %v454_v57, %s1903_s16 }
  0xe9   : > { %545 = vrot.lane.b32.xlu1 %v402_v1, %s1901_s6  ;;  %420 = vrot.lane.b32.xlu0 %v405_v5, %s1896_s26  ;;  %s1905_s26 = smov 56  }
  0xed   : > { %684 = vrot.lane.b32.xlu1 %v457_v60, %s1903_s16  ;;  %581 = vrot.lane.b32.xlu0 %v460_v8, %s1902_s7 }
  0xf1   : > { %476 = vrot.lane.b32.xlu1 %v460_v8, %s1898_s28  ;;  %478 = vrot.lane.b32.xlu0 %v463_v11, %s1898_s28 }
  0xf5   : > { %650 = vrot.lane.b32.xlu1 %v402_v1, %s1899_s29  ;;  %652 = vrot.lane.b32.xlu0 %v405_v5, %s1899_s29 }
  0xf9   : > { %547 = vrot.lane.b32.xlu1 %v405_v5, %s1901_s6  ;;  %549 = vrot.lane.b32.xlu0 %v534_v15, %s1901_s6 }
  0xfd   : > { %686 = vrot.lane.b32.xlu1 %v460_v8, %s1903_s16  ;;  %688 = vrot.lane.b32.xlu0 %v463_v11, %s1903_s16 }
 0x101   : > { %583 = vrot.lane.b32.xlu1 %v463_v11, %s1902_s7  ;;  %654 = vrot.lane.b32.xlu0 %v534_v15, %s1899_s29 }
 0x103   : > { %v499_v23 = vpop.permute.xlu0 %498 }
 0x104   : > { %523 = vst.msk [vmem:[#allocation3] sm:$0xff] %vm522_vm8, %v499_v23 }
 0x105   : > { %585 = vrot.lane.b32.xlu1 %v570_v24, %s1902_s7  ;;  %690 = vrot.lane.b32.xlu0 %v570_v24, %s1903_s16 }
 0x107   : > { %v501_v25 = vpop.permute.xlu1 %500  ;;  %v608_v26 = vpop.permute.xlu0 %607 }
 0x109   : > { %692 = vrot.lane.b32.xlu1 %v677_v16, %s1903_s16 }
 0x10b   : > { %v606_v27 = vpop.permute.xlu1 %605  ;;  %v505_v28 = vpop.permute.xlu0 %504 }
 0x10f   : > { %v503_v45 = vpop.permute.xlu1 %502  ;;  %v2244_v29 = vpop.permute.xlu0 %611 }
 0x113   : > { %v610_v46 = vpop.permute.xlu1 %609  ;;  %v2246_v30 = vpop.permute.xlu0 %508 }
 0x117   : > { %v2248_v31 = vpop.permute.xlu1 %506  ;;  %v2250_v32 = vpop.permute.xlu0 %615 }
 0x11b   : > { %v2252_v33 = vpop.permute.xlu1 %613  ;;  %v2254_v34 = vpop.permute.xlu0 %512 }
 0x11f   : > { %v2256_v35 = vpop.permute.xlu1 %510  ;;  %v2258_v36 = vpop.permute.xlu0 %617 }
 0x123   : > { %v409_v37 = vpop.permute.xlu1 %408  ;;  %v536_v38 = vpop.permute.xlu0 %535 }
 0x124   : > { %432 = vst.msk [vmem:[#allocation3 + $0x8] sm:$0xff] %vm430_vm5, %v409_v37 }
 0x125   : > { %560 = vst.msk [vmem:[#allocation3] sm:$0xff] %vm559_vm9, %v536_v38 }
 0x127   : > { %v467_v39 = vpop.permute.xlu1 %466  ;;  %v538_v40 = vpop.permute.xlu0 %537 }
 0x128   : > { %490 = vst.msk [vmem:[#allocation3 + $0x8] sm:$0xff] %vm488_vm6, %v467_v39 }
 0x129   : > { %524 = vst.msk [vmem:[#allocation3 + $0x8] sm:$0xff] %vm522_vm8, %v501_v25 }
 0x12a   : > { %561 = vst.msk [vmem:[#allocation3 + $0x8] sm:$0xff] %vm559_vm9, %v538_v40 }
 0x12b   : > { %v411_v41 = vpop.permute.xlu1 %410  ;;  %v413_v42 = vpop.permute.xlu0 %412 }
 0x12c   : > { %433 = vst.msk [vmem:[#allocation3 + $0x10] sm:$0xff] %vm430_vm5, %v411_v41  ;;  %434 = vst.msk [vmem:[#allocation3 + $0x18] sm:$0xff] %vm430_vm5, %v413_v42 }
 0x12f   : > { %v572_v43 = vpop.permute.xlu1 %571  ;;  %v574_v44 = vpop.permute.xlu0 %573 }
 0x130   : > { %596 = vst.msk [vmem:[#allocation3] sm:$0xff] %vm595_vm10, %v572_v43  ;;  %597 = vst.msk [vmem:[#allocation3 + $0x8] sm:$0xff] %vm595_vm10, %v574_v44 }
 0x131   : > { %630 = vst.msk [vmem:[#allocation3] sm:$0xff] %vm629_vm11, %v606_v27  ;;  %631 = vst.msk [vmem:[#allocation3 + $0x8] sm:$0xff] %vm629_vm11, %v608_v26 }
 0x133   : > { %v469_v47 = vpop.permute.xlu1 %468  ;;  %v471_v48 = vpop.permute.xlu0 %470 }
 0x134   : > { %491 = vst.msk [vmem:[#allocation3 + $0x10] sm:$0xff] %vm488_vm6, %v469_v47  ;;  %492 = vst.msk [vmem:[#allocation3 + $0x18] sm:$0xff] %vm488_vm6, %v471_v48 }
 0x135   : > { %525 = vst.msk [vmem:[#allocation3 + $0x10] sm:$0xff] %vm522_vm8, %v503_v45  ;;  %526 = vst.msk [vmem:[#allocation3 + $0x18] sm:$0xff] %vm522_vm8, %v505_v28 }
 0x137   : > { %v643_v49 = vpop.permute.xlu1 %642  ;;  %v645_v50 = vpop.permute.xlu0 %644 }
 0x138   : > { %667 = vst.msk [vmem:[#allocation3] sm:$0xff] %vm666_vm12, %v643_v49  ;;  %668 = vst.msk [vmem:[#allocation3 + $0x8] sm:$0xff] %vm666_vm12, %v645_v50 }
 0x13b   : > { %v540_v51 = vpop.permute.xlu1 %539  ;;  %v415_v52 = vpop.permute.xlu0 %414 }
 0x13c   : > { %562 = vst.msk [vmem:[#allocation3 + $0x10] sm:$0xff] %vm559_vm9, %v540_v51 }
 0x13d   : > { %435 = vst.msk [vmem:[#allocation3 + $0x20] sm:$0xff] %vm430_vm5, %v415_v52 }
 0x13f   : > { %v679_v53 = vpop.permute.xlu1 %678  ;;  %v576_v54 = vpop.permute.xlu0 %575 }
 0x140   : > { %703 = vst.msk [vmem:[#allocation3] sm:$0xff] %vm702_vm13, %v679_v53 }
 0x141   : > { %598 = vst.msk [vmem:[#allocation3 + $0x10] sm:$0xff] %vm595_vm10, %v576_v54 }
 0x142   : > { %632 = vst.msk [vmem:[#allocation3 + $0x10] sm:$0xff] %vm629_vm11, %v610_v46 }
 0x143   : > { %v542_v55 = vpop.permute.xlu1 %541  ;;  %v417_v56 = vpop.permute.xlu0 %416 }
 0x144   : > { %563 = vst.msk [vmem:[#allocation3 + $0x18] sm:$0xff] %vm559_vm9, %v542_v55 }
 0x145   : > { %436 = vst.msk [vmem:[#allocation3 + $0x28] sm:$0xff] %vm430_vm5, %v417_v56 }
 0x147   : > { %v681_v57 = vpop.permute.xlu1 %680  ;;  %v578_v58 = vpop.permute.xlu0 %577  ;;  %v711_v59 = vld [vmem:[#allocation3] sm:$0xff] }
 0x148   : > { %704 = vst.msk [vmem:[#allocation3 + $0x8] sm:$0xff] %vm702_vm13, %v681_v57  ;;  %1782 = vmatprep.mubr.msk.f32.mxu0 %vm729_vm14, %v711_v59 }
 0x149   : > { %599 = vst.msk [vmem:[#allocation3 + $0x18] sm:$0xff] %vm595_vm10, %v578_v58 }
 0x14a   : > { %633 = vst.msk [vmem:[#allocation3 + $0x18] sm:$0xff] %vm629_vm11, %v2244_v29 }
 0x14b   : > { %v473_v60 = vpop.permute.xlu1 %472  ;;  %v475_v61 = vpop.permute.xlu0 %474 }
 0x14c   : > { %493 = vst.msk [vmem:[#allocation3 + $0x20] sm:$0xff] %vm488_vm6, %v473_v60  ;;  %494 = vst.msk [vmem:[#allocation3 + $0x28] sm:$0xff] %vm488_vm6, %v475_v61 }
 0x14d   : > { %527 = vst.msk [vmem:[#allocation3 + $0x20] sm:$0xff] %vm522_vm8, %v2248_v31  ;;  %528 = vst.msk [vmem:[#allocation3 + $0x28] sm:$0xff] %vm522_vm8, %v2246_v30  ;;  %v725_v31 = vlaneseq }
 0x14f   : > { %v647_v62 = vpop.permute.xlu1 %646  ;;  %v649_v63 = vpop.permute.xlu0 %648  ;;  %v712_v1 = vld [vmem:[#allocation3 + $0x8] sm:$0xff] }
 0x150   : > { %669 = vst.msk [vmem:[#allocation3 + $0x10] sm:$0xff] %vm666_vm12, %v647_v62  ;;  %670 = vst.msk [vmem:[#allocation3 + $0x18] sm:$0xff] %vm666_vm12, %v649_v63  ;;  %1783 = vmatmul.mubr.msk.f32.vlgmr.msra.gmra.mrb[0].mxu0 %vm729_vm14, %v712_v1 }
 0x153   : > { %v544_v2 = vpop.permute.xlu1 %543  ;;  %v419_v3 = vpop.permute.xlu0 %418 }
 0x154   : > { %564 = vst.msk [vmem:[#allocation3 + $0x20] sm:$0xff] %vm559_vm9, %v544_v2 }
 0x155   : > { %437 = vst.msk [vmem:[#allocation3 + $0x30] sm:$0xff] %vm430_vm5, %v419_v3 }
 0x157   : > { %v683_v4 = vpop.permute.xlu1 %682  ;;  %v580_v5 = vpop.permute.xlu0 %579 }
 0x158   : > { %705 = vst.msk [vmem:[#allocation3 + $0x10] sm:$0xff] %vm702_vm13, %v683_v4 }
 0x159   : > { %600 = vst.msk [vmem:[#allocation3 + $0x20] sm:$0xff] %vm595_vm10, %v580_v5 }
 0x15a   : > { %634 = vst.msk [vmem:[#allocation3 + $0x20] sm:$0xff] %vm629_vm11, %v2252_v33 }
 0x15b   : > { %v546_v6 = vpop.permute.xlu1 %545  ;;  %v421_v7 = vpop.permute.xlu0 %420 }
 0x15c   : > { %565 = vst.msk [vmem:[#allocation3 + $0x28] sm:$0xff] %vm559_vm9, %v546_v6 }
 0x15d   : > { %438 = vst.msk [vmem:[#allocation3 + $0x38] sm:$0xff] %vm430_vm5, %v421_v7  ;;  %vm1265_vm5 = vcmask 392512  }
 0x15f   : > { %v685_v8 = vpop.permute.xlu1 %684  ;;  %v582_v9 = vpop.permute.xlu0 %581  ;;  %v713_v10 = vld [vmem:[#allocation3 + $0x10] sm:$0xff] }
 0x160   : > { %706 = vst.msk [vmem:[#allocation3 + $0x18] sm:$0xff] %vm702_vm13, %v685_v8  ;;  %1785 = vmatprep.mubr.msk.f32.mxu0 %vm729_vm14, %v713_v10 }
 0x161   : > { %601 = vst.msk [vmem:[#allocation3 + $0x28] sm:$0xff] %vm595_vm10, %v582_v9 }
 0x162   : > { %635 = vst.msk [vmem:[#allocation3 + $0x28] sm:$0xff] %vm629_vm11, %v2250_v32  ;;  %v2339_v32 = vshrl.u32 %v725_v31, 7 }
 0x163   : > { %v477_v11 = vpop.permute.xlu1 %476  ;;  %v479_v12 = vpop.permute.xlu0 %478 }
 0x164   : > { %495 = vst.msk [vmem:[#allocation3 + $0x30] sm:$0xff] %vm488_vm6, %v477_v11  ;;  %496 = vst.msk [vmem:[#allocation3 + $0x38] sm:$0xff] %vm488_vm6, %v479_v12  ;;  %vm1299_vm6 = vcmask 458112  }
 0x165   : > { %529 = vst.msk [vmem:[#allocation3 + $0x30] sm:$0xff] %vm522_vm8, %v2256_v35  ;;  %530 = vst.msk [vmem:[#allocation3 + $0x38] sm:$0xff] %vm522_vm8, %v2254_v34  ;;  %v727_v34 = vsub.s32 0, %v2339_v32  ;;  %vm1372_vm8 = vcmask 589312  }
 0x167   : > { %v651_v13 = vpop.permute.xlu1 %650  ;;  %v653_v14 = vpop.permute.xlu0 %652  ;;  %v714_v15 = vld [vmem:[#allocation3 + $0x18] sm:$0xff] }
 0x168   : > { %671 = vst.msk [vmem:[#allocation3 + $0x20] sm:$0xff] %vm666_vm12, %v651_v13  ;;  %672 = vst.msk [vmem:[#allocation3 + $0x28] sm:$0xff] %vm666_vm12, %v653_v14  ;;  %1786 = vmatmul.mubr.msk.f32.gmra.mrb[2].mxu0 %vm729_vm14, %v714_v15 }
 0x16b   : > { %v548_v18 = vpop.permute.xlu1 %547  ;;  %v550_v19 = vpop.permute.xlu0 %549 }
 0x16c   : > { %566 = vst.msk [vmem:[#allocation3 + $0x30] sm:$0xff] %vm559_vm9, %v548_v18  ;;  %567 = vst.msk [vmem:[#allocation3 + $0x38] sm:$0xff] %vm559_vm9, %v550_v19  ;;  %vm1403_vm9 = vcmask 588800  }
 0x16f   : > { %v687_v21 = vpop.permute.xlu1 %686  ;;  %v689_v22 = vpop.permute.xlu0 %688 }
 0x170   : > { %707 = vst.msk [vmem:[#allocation3 + $0x20] sm:$0xff] %vm702_vm13, %v687_v21  ;;  %708 = vst.msk [vmem:[#allocation3 + $0x28] sm:$0xff] %vm702_vm13, %v689_v22 }
 0x173   : > { %v584_v23 = vpop.permute.xlu1 %583  ;;  %v655_v24 = vpop.permute.xlu0 %654 }
 0x174   : > { %602 = vst.msk [vmem:[#allocation3 + $0x30] sm:$0xff] %vm595_vm10, %v584_v23 }
 0x175   : > { %636 = vst.msk [vmem:[#allocation3 + $0x30] sm:$0xff] %vm629_vm11, %v2258_v36 }
 0x176   : > { %673 = vst.msk [vmem:[#allocation3 + $0x30] sm:$0xff] %vm666_vm12, %v655_v24 }
 0x177   : > { %v586_v16 = vpop.permute.xlu1 %585  ;;  %v691_v25 = vpop.permute.xlu0 %690  ;;  %v715_v26 = vld [vmem:[#allocation3 + $0x20] sm:$0xff]  ;;  %v716_v27 = vld [vmem:[#allocation3 + $0x28] sm:$0xff] }
 0x178   : > { %603 = vst.msk [vmem:[#allocation3 + $0x38] sm:$0xff] %vm595_vm10, %v586_v16  ;;  %1788 = vmatprep.mubr.msk.f32.mxu0 %vm729_vm14, %v715_v26 }
 0x179   : > { %709 = vst.msk [vmem:[#allocation3 + $0x30] sm:$0xff] %vm702_vm13, %v691_v25  ;;  %1789 = vmatmul.mubr.msk.f32.gmra.mrb[4].mxu0 %vm729_vm14, %v716_v27 }
 0x17a   : > { %637 = vst.msk [vmem:[#allocation3 + $0x38] sm:$0xff] %vm629_vm11, %v2227_v17 }
 0x17b   : > { %674 = vst.msk [vmem:[#allocation3 + $0x38] sm:$0xff] %vm666_vm12, %v2234_v20  ;;  %v693_v28 = vpop.permute.xlu1 %692  ;;  %v2345_v20 = vld [vmem:[%s2750_s2] sm:$0x7] }
 0x17c   : > { %710 = vst.msk [vmem:[#allocation3 + $0x38] sm:$0xff] %vm702_vm13, %v693_v28  ;;  %v728_v35 = vrot.slane %v2345_v20, %v727_v34 }
 0x180   : > { %v717_v45 = vld [vmem:[#allocation3 + $0x30] sm:$0xff] }
 0x181   : > { %1791 = vmatprep.mubr.msk.f32.mxu0 %vm729_vm14, %v717_v45 }
 0x183   : > { %v718_v29 = vld [vmem:[#allocation3 + $0x38] sm:$0xff] }
 0x184   : > { %1792 = vmatmul.mubr.msk.f32.gmra.mrb[6].mxu0 %vm729_vm14, %v718_v29 }
 0x223   : > { %v1784_v46 = vpop.f32.mrb[0].mxu0 }
 0x224   : > { %v824_v30 = vpop.f32.mrb[1].mxu0  ;;  %v830_v36 = vadd.f32 %v1784_v46, %v728_v35 }
 0x225   : > { %v825_v37 = vadd.f32 %v824_v30, %v728_v35 }
 0x226   : > { %v864_v39 = vsel %vm241_vm0, %v830_v36, 0.0 }
 0x227   : > { %v863_v40 = vsel %vm241_vm0, %v825_v37, 0.0 }
 0x228   : > { %v865_v44 = vadd.f32 %v864_v39, %v863_v40 }
 0x23b   : > { %v1787_v17 = vpop.f32.mrb[2].mxu0 }
 0x23c   : > { %v834_v33 = vpop.f32.mrb[3].mxu0  ;;  %v840_v47 = vadd.f32 %v1787_v17, %v728_v35 }
 0x23d   : > { %v835_v38 = vadd.f32 %v834_v33, %v728_v35 }
 0x23e   : > { %v868_v50 = vsel %vm241_vm0, %v840_v47, 0.0 }
 0x23f   : > { %v866_v42 = vsel %vm241_vm0, %v835_v38, 0.0 }
 0x240   : > { %v867_v49 = vadd.f32 %v866_v42, %v865_v44 }
 0x242   : > { %v869_v52 = vadd.f32 %v868_v50, %v867_v49  ;;  %v1009_v49 = vld [vmem:[#allocation4] sm:$0xff]  ;;  %v1010_v50 = vld [vmem:[#allocation4 + $0x8] sm:$0x3] }
 0x243   : > { %1029 = vst.msk [vmem:[#allocation5] sm:$0xff] %vm241_vm0, %v1009_v49 }
 0x24c   : > { %v1790_v41 = vpop.f32.mrb[4].mxu0 }
 0x24d   : > { %v844_v43 = vpop.f32.mrb[5].mxu0  ;;  %v850_v53 = vadd.f32 %v1790_v41, %v728_v35 }
 0x24e   : > { %v845_v48 = vadd.f32 %v844_v43, %v728_v35 }
 0x24f   : > { %v872_v57 = vsel %vm241_vm0, %v850_v53, 0.0 }
 0x250   : > { %v870_v51 = vsel %vm241_vm0, %v845_v48, 0.0 }
 0x251   : > { %v871_v54 = vadd.f32 %v870_v51, %v869_v52  ;;  %v1053_v52 = vrot.slane %v1009_v49, 1 }
 0x253   : > { %v873_v60 = vadd.f32 %v872_v57, %v871_v54  ;;  %v1110_v57 = vrot.slane %v1009_v49, 2 }
 0x257   : > { %v1793_v55 = vpop.f32.mrb[6].mxu0 }
 0x258   : > { %v854_v56 = vpop.f32.mrb[7].mxu0  ;;  %v860_v58 = vadd.f32 %v1793_v55, %v728_v35 }
 0x259   : > { %v855_v59 = vadd.f32 %v854_v56, %v728_v35  ;;  %v2410_v56 = vld [vmem:[#allocation4 + $0x90] sm:$0xff] }
 0x25a   : > { %v876_v63 = vsel %vm241_vm0, %v860_v58, 0.0  ;;  %v1309_v0 = vrot.slane %v2410_v56, 1 }
 0x25b   : > { %v874_v61 = vsel %vm241_vm0, %v855_v59, 0.0 }
 0x25c   : > { %v875_v62 = vadd.f32 %v874_v61, %v873_v60 }
 0x25e   : > { %v877_v1 = vadd.f32 %v876_v63, %v875_v62 }
 0x260   : > { %878 = vadd.xlane.f32.xlu0 %v877_v1 }
 0x2ed   : > { %v879_v2 = vpop.xlane.xlu0 %878 }
 0x2ee   : > { %v880_v3 = vrot.slane %v879_v2, 4 }
 0x2f0   : > { %v881_v4 = vadd.f32 %v880_v3, %v879_v2  ;;  %v949_v2 = vsub.s32 1, %v2339_v32  ;;  %v961_v3 = vsub.s32 2, %v2339_v32 }
 0x2f2   : > { %v882_v5 = vrot.slane %v881_v4, 2 }
 0x2f4   : > { %v883_v6 = vadd.f32 %v882_v5, %v881_v4  ;;  %v950_v5 = vrot.slane %v2345_v20, %v949_v2 }
 0x2f6   : > { %v884_v7 = vrot.slane %v883_v6, 1 }
 0x2f8   : > { %v885_v8 = vadd.f32 %v884_v7, %v883_v6  ;;  %v962_v6 = vrot.slane %v2345_v20, %v961_v3 }
 0x2fa   : > { %1848 = vpush %v885_v8 }
 0x32b   : > { %s1849_s23 = spop %1848 }
 0x32c   : > { %s889_s24 = smul.f32 0.001953125, %s1849_s23 }
 0x32e   : > { %v890_v9 = vstv %s889_s24 }
 0x32f   : > { %v2358_v10 = vsub.f32 %v825_v37, %v890_v9  ;;  %v2360_v11 = vsub.f32 %v830_v36, %v890_v9  ;;  %v2362_v12 = vsub.f32 %v835_v38, %v890_v9  ;;  %v2364_v13 = vsub.f32 %v840_v47, %v890_v9 }
 0x330   : > { %v2366_v14 = vsub.f32 %v845_v48, %v890_v9  ;;  %v2374_v21 = vsub.f32 %v850_v53, %v890_v9  ;;  %v2380_v25 = vsub.f32 %v855_v59, %v890_v9  ;;  %v2385_v45 = vsub.f32 %v860_v58, %v890_v9  ;;  %v2412_v59 = vld [vmem:[#allocation4 + $0x98] sm:$0x3] }
 0x331   : > { %v899_v15 = vmul.f32 %v2358_v10, %v2358_v10  ;;  %v900_v18 = vmul.f32 %v2360_v11, %v2360_v11  ;;  %v901_v19 = vmul.f32 %v2362_v12, %v2362_v12  ;;  %v902_v22 = vmul.f32 %v2364_v13, %v2364_v13 }
 0x332   : > { %v903_v26 = vmul.f32 %v2366_v14, %v2366_v14  ;;  %v904_v29 = vmul.f32 %v2374_v21, %v2374_v21  ;;  %v905_v31 = vmul.f32 %v2380_v25, %v2380_v25  ;;  %v906_v35 = vmul.f32 %v2385_v45, %v2385_v45 }
 0x333   : > { %v907_v23 = vsel %vm241_vm0, %v899_v15, 0.0  ;;  %v908_v24 = vsel %vm241_vm0, %v900_v18, 0.0  ;;  %v910_v27 = vsel %vm241_vm0, %v901_v19, 0.0  ;;  %v912_v46 = vsel %vm241_vm0, %v902_v22, 0.0 }
 0x334   : > { %v909_v16 = vadd.f32 %v908_v24, %v907_v23  ;;  %v914_v17 = vsel %vm241_vm0, %v903_v26, 0.0  ;;  %v916_v36 = vsel %vm241_vm0, %v904_v29, 0.0  ;;  %v918_v38 = vsel %vm241_vm0, %v905_v31, 0.0 }
 0x335   : > { %v920_v40 = vsel %vm241_vm0, %v906_v35, 0.0  ;;  %v1054_v53 = vrot.slane %v1010_v50, 1  ;;  %v1111_v58 = vrot.slane %v1010_v50, 2  ;;  %v1310_v60 = vrot.slane %v2412_v59, 1 }
 0x336   : > { %v911_v28 = vadd.f32 %v910_v27, %v909_v16 }
 0x337   : > { %v1055_v55 = vsel %vm381_vm3, %v1053_v52, %v1054_v53  ;;  %v1112_v61 = vsel %vm439_vm4, %v1110_v57, %v1111_v58  ;;  %v1311_v62 = vsel %vm381_vm3, %v1309_v0, %v1310_v60 }
 0x338   : > { %v913_v30 = vadd.f32 %v912_v46, %v911_v28  ;;  %1077 = vrot.lane.b32.xlu0 %v1055_v55, %s1898_s28 }
 0x33a   : > { %v915_v33 = vadd.f32 %v914_v17, %v913_v30 }
 0x33c   : > { %v917_v37 = vadd.f32 %v916_v36, %v915_v33  ;;  %1134 = vrot.lane.b32.xlu0 %v1112_v61, %s1901_s6 }
 0x33e   : > { %v919_v39 = vadd.f32 %v918_v38, %v917_v37 }
 0x340   : > { %v921_v41 = vadd.f32 %v920_v40, %v919_v39 }
 0x342   : > { %922 = vadd.xlane.f32.xlu1 %v921_v41 }
 0x353   : > { %1289 = vrot.lane.b32.xlu1 %v2410_v56, %s1904_s25 }
 0x357   : > { %1326 = vrot.lane.b32.xlu1 %v1311_v62, %s1905_s26 }
 0x3aa   : > { %v1078_v4 = vpop.permute.xlu0 %1077 }
 0x3ab   : > { %1102 = vst.msk [vmem:[#allocation5] sm:$0xff] %vm1101_vm1, %v1078_v4 }
 0x3ae   : > { %v1135_v19 = vpop.permute.xlu0 %1134 }
 0x3af   : > { %1159 = vst.msk [vmem:[#allocation5] sm:$0xff] %vm1158_vm2, %v1135_v19 }
 0x3cf   : > { %v923_v42 = vpop.xlane.xlu1 %922 }
 0x3d0   : > { %v924_v43 = vrot.slane %v923_v42, 4 }
 0x3d2   : > { %v925_v44 = vadd.f32 %v924_v43, %v923_v42 }
 0x3d4   : > { %v926_v47 = vrot.slane %v925_v44, 2 }
 0x3d6   : > { %v927_v48 = vadd.f32 %v926_v47, %v925_v44 }
 0x3d8   : > { %v928_v51 = vrot.slane %v927_v48, 1 }
 0x3da   : > { %v929_v54 = vadd.f32 %v928_v51, %v927_v48 }
 0x3dc   : > { %1850 = vpush %v929_v54 }
 0x40d   : > { %s1851_s29 = spop %1850 }
 0x40e   : > { %s933_s30 = smul.f32 0.001953125, %s1851_s29 }
 0x410   : > { %s934_s7 = sadd.f32 1e-05, %s933_s30 }
 0x412   : > { %v935_v63 = vstv %s934_s7  ;;  %s1907_s7 = smov 64  }
 0x413   : > { %1882 = vrsqrt.f32 %v935_v63 }
 0x41d   : > { %v1883_v1 = vpop.eup %1882 }
 0x41e   : > { %1852 = vpush %v1883_v1 }
 0x44f   : > { %s1853_s8 = spop %1852 }
 0x450   : > { %v938_v7 = vstv %s1853_s8 }
 0x451   : > { %v939_v8 = vmul.f32 %v938_v7, %v2358_v10  ;;  %v940_v9 = vmul.f32 %v938_v7, %v2360_v11  ;;  %v941_v15 = vmul.f32 %v938_v7, %v2362_v12  ;;  %v942_v18 = vmul.f32 %v938_v7, %v2364_v13 }
 0x452   : > { %v943_v22 = vmul.f32 %v938_v7, %v2366_v14  ;;  %v944_v23 = vmul.f32 %v938_v7, %v2374_v21  ;;  %v945_v24 = vmul.f32 %v938_v7, %v2380_v25  ;;  %v946_v16 = vmul.f32 %v938_v7, %v2385_v45 }
 0x453   : > { %v951_v20 = vmul.f32 %v950_v5, %v939_v8  ;;  %v952_v26 = vmul.f32 %v950_v5, %v940_v9  ;;  %v953_v10 = vmul.f32 %v950_v5, %v941_v15  ;;  %v954_v27 = vmul.f32 %v950_v5, %v942_v18  ;;  %v1389_v8 = vld [vmem:[%s2751_s3] sm:$0xff]  ;;  %v1390_v9 = vld [vmem:[%s2751_s3 + $0x8] sm:$0xff] }
 0x454   : > { %v955_v11 = vmul.f32 %v950_v5, %v943_v22  ;;  %v956_v28 = vmul.f32 %v950_v5, %v944_v23  ;;  %v957_v12 = vmul.f32 %v950_v5, %v945_v24  ;;  %v958_v29 = vmul.f32 %v950_v5, %v946_v16  ;;  %v1391_v23 = vld [vmem:[%s2751_s3 + $0x10] sm:$0xff]  ;;  %v1392_v24 = vld [vmem:[%s2751_s3 + $0x18] sm:$0xff] }
 0x455   : > { %v963_v13 = vadd.f32 %v962_v6, %v951_v20  ;;  %v964_v46 = vadd.f32 %v962_v6, %v952_v26  ;;  %v965_v30 = vadd.f32 %v962_v6, %v953_v10  ;;  %v966_v14 = vadd.f32 %v962_v6, %v954_v27  ;;  %v1393_v10 = vld [vmem:[%s2751_s3 + $0x20] sm:$0xff]  ;;  %v1394_v27 = vld [vmem:[%s2751_s3 + $0x28] sm:$0xff] }
 0x456   : > { %v967_v31 = vadd.f32 %v962_v6, %v955_v11  ;;  %v968_v21 = vadd.f32 %v962_v6, %v956_v28  ;;  %v969_v17 = vadd.f32 %v962_v6, %v957_v12  ;;  %v970_v25 = vadd.f32 %v962_v6, %v958_v29  ;;  %v1395_v29 = vld [vmem:[%s2751_s3 + $0x30] sm:$0xff] }
 0x457   : > { %v971_v33 = vmax.f32 %v963_v13, 0.0  ;;  %v972_v45 = vmax.f32 %v964_v46, 0.0  ;;  %v973_v35 = vmax.f32 %v965_v30, 0.0  ;;  %v974_v36 = vmax.f32 %v966_v14, 0.0  ;;  %v1396_v13 = vld [vmem:[%s2751_s3 + $0x38] sm:$0xff] }
 0x458   : > { %v975_v37 = vmax.f32 %v967_v31, 0.0  ;;  %v976_v38 = vmax.f32 %v968_v21, 0.0  ;;  %v977_v39 = vmax.f32 %v969_v17, 0.0  ;;  %v978_v40 = vmax.f32 %v970_v25, 0.0  ;;  %v1397_v31 = vld [vmem:[%s2751_s3 + $0x40] sm:$0xff] }
 0x459   : > { %1001 = vst.msk [vmem:[#allocation4 + $0x11] sm:$0xff] %vm241_vm0, %v971_v33  ;;  %1002 = vst.msk [vmem:[#allocation4 + $0x21] sm:$0xff] %vm241_vm0, %v972_v45  ;;  %v1832_v15 = vpack.c.bf16 %v1390_v9, %v1389_v8  ;;  %v1836_v16 = vpack.c.bf16 %v1392_v24, %v1391_v23  ;;  %v1840_v11 = vpack.c.bf16 %v1394_v27, %v1393_v10 }
 0x45a   : > { %1003 = vst.msk [vmem:[#allocation4 + $0x31] sm:$0xff] %vm241_vm0, %v973_v35  ;;  %1004 = vst.msk [vmem:[#allocation4 + $0x41] sm:$0xff] %vm241_vm0, %v974_v36  ;;  %v1844_v46 = vpack.c.bf16 %v1396_v13, %v1395_v29 }
 0x45b   : > { %1005 = vst.msk [vmem:[#allocation4 + $0x51] sm:$0xff] %vm241_vm0, %v975_v37  ;;  %1006 = vst.msk [vmem:[#allocation4 + $0x61] sm:$0xff] %vm241_vm0, %v976_v38  ;;  %1833 = vmatprep.subr.bf16.mxu1 %v1832_v15 }
 0x45c   : > { %1007 = vst.msk [vmem:[#allocation4 + $0x71] sm:$0xff] %vm241_vm0, %v977_v39  ;;  %1008 = vst.msk [vmem:[#allocation4 + $0x81] sm:$0xff] %vm241_vm0, %v978_v40  ;;  %1835 = vmatpush3.bf16.msra.mxu1 %v1832_v15 }
 0x45d   : > { %1837 = vmatprep.subr.bf16.mxu1 %v1836_v16 }
 0x460   : > { %v1013_v41 = vld [vmem:[#allocation4 + $0x20] sm:$0xff]  ;;  %v1011_v42 = vld [vmem:[#allocation4 + $0x10] sm:$0xff]  ;;  %v1012_v50 = vld [vmem:[#allocation4 + $0x18] sm:$0x3]  ;;  %1839 = vmatpush3.bf16.msra.mxu1 %v1836_v16 }
 0x461   : > { %v2449_v43 = vld [vmem:[#allocation4 + $0x30] sm:$0xff]  ;;  %1170 = vrot.lane.b32.xlu1 %v1013_v41, %s1897_s27  ;;  %1031 = vst.msk [vmem:[#allocation5 + $0x10] sm:$0xff] %vm241_vm0, %v1013_v41  ;;  %1168 = vrot.lane.b32.xlu0 %v1011_v42, %s1897_s27  ;;  %1030 = vst.msk [vmem:[#allocation5 + $0x8] sm:$0xff] %vm241_vm0, %v1011_v42  ;;  %v2457_v44 = vld [vmem:[#allocation4 + $0x40] sm:$0xff]  ;;  %v1056_v52 = vrot.slane %v1011_v42, 1  ;;  %v1057_v53 = vrot.slane %v1012_v50, 1 }
 0x462   : > { %1032 = vst.msk [vmem:[#allocation5 + $0x18] sm:$0xff] %vm241_vm0, %v2449_v43  ;;  %v2459_v47 = vld [vmem:[#allocation4 + $0x50] sm:$0xff]  ;;  %v2461_v48 = vld [vmem:[#allocation4 + $0x60] sm:$0xff]  ;;  %1033 = vst.msk [vmem:[#allocation5 + $0x20] sm:$0xff] %vm241_vm0, %v2457_v44  ;;  %v1113_v55 = vrot.slane %v1011_v42, 2  ;;  %v1114_v57 = vrot.slane %v1012_v50, 2  ;;  %1841 = vmatprep.subr.bf16.mxu1 %v1840_v11 }
 0x463   : > { %1034 = vst.msk [vmem:[#allocation5 + $0x28] sm:$0xff] %vm241_vm0, %v2459_v47  ;;  %1035 = vst.msk [vmem:[#allocation5 + $0x30] sm:$0xff] %vm241_vm0, %v2461_v48  ;;  %v2469_v49 = vld [vmem:[#allocation4 + $0x70] sm:$0xff]  ;;  %v2492_v51 = vld [vmem:[#allocation4 + $0x80] sm:$0xff]  ;;  %v1058_v54 = vsel %vm381_vm3, %v1056_v52, %v1057_v53  ;;  %v1059_v60 = vrot.slane %v1013_v41, 1  ;;  %v1062_v1 = vrot.slane %v2449_v43, 1 }
 0x464   : > { %1036 = vst.msk [vmem:[#allocation5 + $0x38] sm:$0xff] %vm241_vm0, %v2469_v49  ;;  %v1014_v58 = vld [vmem:[#allocation4 + $0x28] sm:$0x3]  ;;  %v1115_v0 = vsel %vm439_vm4, %v1113_v55, %v1114_v57  ;;  %v1016_v62 = vld [vmem:[#allocation4 + $0x38] sm:$0x3]  ;;  %v1116_v6 = vrot.slane %v1013_v41, 2  ;;  %1843 = vmatpush3.bf16.msra.mxu1 %v1840_v11 }
 0x465   : > { %1275 = vrot.lane.b32.xlu1 %v1013_v41, %s1904_s25  ;;  %1277 = vrot.lane.b32.xlu0 %v2449_v43, %s1904_s25  ;;  %v1060_v61 = vrot.slane %v1014_v58, 1  ;;  %v1063_v4 = vrot.slane %v1016_v62, 1  ;;  %v1117_v7 = vrot.slane %v1014_v58, 2  ;;  %v1119_v19 = vrot.slane %v2449_v43, 2  ;;  %v1018_v26 = vld [vmem:[#allocation4 + $0x48] sm:$0x3] }
 0x466   : > { %v1120_v22 = vrot.slane %v1016_v62, 2  ;;  %v1065_v28 = vrot.slane %v2457_v44, 1  ;;  %v1066_v12 = vrot.slane %v1018_v26, 1  ;;  %1845 = vmatprep.subr.bf16.mxu1 %v1844_v46  ;;  %v1020_v14 = vld [vmem:[#allocation4 + $0x58] sm:$0x3]  ;;  %v1068_v21 = vrot.slane %v2459_v47, 1 }
 0x467   : > { %v1061_v63 = vsel %vm381_vm3, %v1059_v60, %v1060_v61  ;;  %v1064_v5 = vsel %vm381_vm3, %v1062_v1, %v1063_v4  ;;  %v1118_v18 = vsel %vm439_vm4, %v1116_v6, %v1117_v7  ;;  %v1069_v17 = vrot.slane %v1020_v14, 1  ;;  %v1022_v39 = vld [vmem:[#allocation4 + $0x68] sm:$0x3] }
 0x468   : > { %v1121_v20 = vsel %vm439_vm4, %v1119_v19, %v1120_v22  ;;  %v1067_v30 = vsel %vm381_vm3, %v1065_v28, %v1066_v12  ;;  %1847 = vmatpush3.bf16.msra.mxu1 %v1844_v46  ;;  %v1122_v33 = vrot.slane %v2457_v44, 2  ;;  %v1123_v45 = vrot.slane %v1018_v26, 2 }
 0x469   : > { %1172 = vrot.lane.b32.xlu1 %v2449_v43, %s1897_s27  ;;  %1174 = vrot.lane.b32.xlu0 %v2457_v44, %s1897_s27  ;;  %v1070_v25 = vsel %vm381_vm3, %v1068_v21, %v1069_v17  ;;  %v1125_v36 = vrot.slane %v2459_v47, 2  ;;  %v1126_v37 = vrot.slane %v1020_v14, 2  ;;  %v1071_v40 = vrot.slane %v2461_v48, 1  ;;  %v1024_v43 = vld [vmem:[#allocation4 + $0x78] sm:$0x3] }
 0x46a   : > { %1810 = vmatprep.subr.mxu1 %v1397_v31  ;;  %v1124_v35 = vsel %vm439_vm4, %v1122_v33, %v1123_v45  ;;  %v1072_v41 = vrot.slane %v1022_v39, 1  ;;  %v1128_v52 = vrot.slane %v2461_v48, 2  ;;  %v1129_v53 = vrot.slane %v1022_v39, 2 }
 0x46b   : > { %v1127_v38 = vsel %vm439_vm4, %v1125_v36, %v1126_v37  ;;  %v1131_v55 = vrot.slane %v2469_v49, 2  ;;  %v1132_v57 = vrot.slane %v1024_v43, 2  ;;  %v1238_v62 = vrot.slane %v2492_v51, 2 }
 0x46c   : > { %1811 = vmatpush3.msra.mxu1 %v1397_v31  ;;  %v1073_v42 = vsel %vm381_vm3, %v1071_v40, %v1072_v41  ;;  %v1345_v4 = vrot.slane %v2410_v56, 2 }
 0x46d   : > { %1279 = vrot.lane.b32.xlu1 %v2457_v44, %s1904_s25  ;;  %1281 = vrot.lane.b32.xlu0 %v2459_v47, %s1904_s25  ;;  %v1074_v44 = vrot.slane %v2469_v49, 1  ;;  %v1133_v58 = vsel %vm439_vm4, %v1131_v55, %v1132_v57 }
 0x471   : > { %1176 = vrot.lane.b32.xlu1 %v2459_v47, %s1897_s27  ;;  %1178 = vrot.lane.b32.xlu0 %v2461_v48, %s1897_s27  ;;  %v1075_v47 = vrot.slane %v1024_v43, 1 }
 0x473   : > { %v1076_v50 = vsel %vm381_vm3, %v1074_v44, %v1075_v47 }
 0x475   : > { %1283 = vrot.lane.b32.xlu1 %v2461_v48, %s1904_s25  ;;  %1285 = vrot.lane.b32.xlu0 %v2469_v49, %s1904_s25  ;;  %v1026_v48 = vld [vmem:[#allocation4 + $0x88] sm:$0x3] }
 0x476   : > { %v1203_v60 = vrot.slane %v1026_v48, 1 }
 0x479   : > { %1180 = vrot.lane.b32.xlu1 %v2469_v49, %s1897_s27  ;;  %1182 = vrot.lane.b32.xlu0 %v2492_v51, %s1897_s27  ;;  %v2589_v49 = vpop.permute.xlu1 %1289 }
 0x47d   : > { %1287 = vrot.lane.b32.xlu0 %v2492_v51, %s1904_s25  ;;  %1079 = vrot.lane.b32.xlu1 %v1058_v54, %s1898_s28  ;;  %v2597_v1 = vpop.permute.xlu1 %1326 }
 0x481   : > { %1205 = vrot.lane.b32.xlu0 %v1058_v54, %s1903_s16  ;;  %1136 = vrot.lane.b32.xlu1 %v1115_v0, %s1901_s6  ;;  %v1130_v54 = vsel %vm439_vm4, %v1128_v52, %v1129_v53 }
 0x485   : > { %1207 = vrot.lane.b32.xlu0 %v1061_v63, %s1903_s16  ;;  %1081 = vrot.lane.b32.xlu1 %v1061_v63, %s1898_s28 }
 0x489   : > { %1083 = vrot.lane.b32.xlu0 %v1064_v5, %s1898_s28  ;;  %1241 = vrot.lane.b32.xlu1 %v1115_v0, %s1906_s12  ;;  %v1202_v0 = vrot.slane %v2492_v51, 1 }
 0x48b   : > { %v1204_v61 = vsel %vm381_vm3, %v1202_v0, %v1203_v60  ;;  %vm1192_vm3 = vcmask 261312  }
 0x48d   : > { %1243 = vrot.lane.b32.xlu0 %v1118_v18, %s1906_s12  ;;  %1138 = vrot.lane.b32.xlu1 %v1118_v18, %s1901_s6 }
 0x491   : > { %1140 = vrot.lane.b32.xlu0 %v1121_v20, %s1901_s6  ;;  %1312 = vrot.lane.b32.xlu1 %v1061_v63, %s1905_s26  ;;  %v1239_v63 = vrot.slane %v1026_v48, 2 }
 0x493   : > { %v1240_v6 = vsel %vm439_vm4, %v1238_v62, %v1239_v63 }
 0x495   : > { %1314 = vrot.lane.b32.xlu0 %v1064_v5, %s1905_s26  ;;  %1209 = vrot.lane.b32.xlu1 %v1064_v5, %s1903_s16  ;;  %v1346_v5 = vrot.slane %v2412_v59, 2 }
 0x497   : > { %v1347_v51 = vsel %vm439_vm4, %v1345_v4, %v1346_v5  ;;  %vm1229_vm4 = vcmask 326912  }
 0x499   : > { %1085 = vrot.lane.b32.xlu0 %v1067_v30, %s1898_s28  ;;  %1348 = vrot.lane.b32.xlu1 %v1118_v18, %s1907_s7 }
 0x49d   : > { %1245 = vrot.lane.b32.xlu0 %v1121_v20, %s1906_s12  ;;  %1211 = vrot.lane.b32.xlu1 %v1067_v30, %s1903_s16 }
 0x4a1   : > { %1087 = vrot.lane.b32.xlu0 %v1070_v25, %s1898_s28  ;;  %1350 = vrot.lane.b32.xlu1 %v1121_v20, %s1907_s7 }
 0x4a5   : > { %1247 = vrot.lane.b32.xlu0 %v1124_v35, %s1906_s12  ;;  %1142 = vrot.lane.b32.xlu1 %v1124_v35, %s1901_s6 }
 0x4a9   : > { %1144 = vrot.lane.b32.xlu0 %v1127_v38, %s1901_s6  ;;  %1316 = vrot.lane.b32.xlu1 %v1067_v30, %s1905_s26 }
 0x4ad   : > { %1318 = vrot.lane.b32.xlu0 %v1070_v25, %s1905_s26  ;;  %1213 = vrot.lane.b32.xlu1 %v1070_v25, %s1903_s16 }
 0x4b1   : > { %1089 = vrot.lane.b32.xlu0 %v1073_v42, %s1898_s28  ;;  %1352 = vrot.lane.b32.xlu1 %v1124_v35, %s1907_s7 }
 0x4b5   : > { %1249 = vrot.lane.b32.xlu0 %v1127_v38, %s1906_s12  ;;  %1215 = vrot.lane.b32.xlu1 %v1073_v42, %s1903_s16 }
 0x4b9   : > { %1091 = vrot.lane.b32.xlu0 %v1076_v50, %s1898_s28  ;;  %1354 = vrot.lane.b32.xlu1 %v1127_v38, %s1907_s7 }
 0x4bd   : > { %1251 = vrot.lane.b32.xlu0 %v1130_v54, %s1906_s12  ;;  %1146 = vrot.lane.b32.xlu1 %v1130_v54, %s1901_s6 }
 0x4c1   : > { %1148 = vrot.lane.b32.xlu0 %v1133_v58, %s1901_s6  ;;  %1320 = vrot.lane.b32.xlu1 %v1073_v42, %s1905_s26 }
 0x4c5   : > { %1322 = vrot.lane.b32.xlu0 %v1076_v50, %s1905_s26  ;;  %1217 = vrot.lane.b32.xlu1 %v1076_v50, %s1903_s16 }
 0x4c9   : > { %1219 = vrot.lane.b32.xlu0 %v1204_v61, %s1903_s16  ;;  %1356 = vrot.lane.b32.xlu1 %v1130_v54, %s1907_s7 }
 0x4cd   : > { %1358 = vrot.lane.b32.xlu0 %v1133_v58, %s1907_s7  ;;  %1253 = vrot.lane.b32.xlu1 %v1133_v58, %s1906_s12 }
 0x4d1   : > { %1324 = vrot.lane.b32.xlu0 %v1204_v61, %s1905_s26  ;;  %1255 = vrot.lane.b32.xlu1 %v1240_v6, %s1906_s12 }
 0x4d3   : > { %v1171_v7 = vpop.permute.xlu1 %1170  ;;  %v1169_v8 = vpop.permute.xlu0 %1168 }
 0x4d4   : > { %1193 = vst.msk [vmem:[#allocation5] sm:$0xff] %vm1192_vm3, %v1169_v8 }
 0x4d5   : > { %1360 = vrot.lane.b32.xlu0 %v1240_v6, %s1907_s7  ;;  %1362 = vrot.lane.b32.xlu1 %v1347_v51, %s1907_s7 }
 0x4d7   : > { %v1276_v56 = vpop.permute.xlu1 %1275  ;;  %v1278_v9 = vpop.permute.xlu0 %1277 }
 0x4db   : > { %v1173_v59 = vpop.permute.xlu1 %1172  ;;  %v1175_v15 = vpop.permute.xlu0 %1174 }
 0x4df   : > { %v1280_v18 = vpop.permute.xlu1 %1279  ;;  %v2608_v19 = vpop.permute.xlu0 %1281 }
 0x4e3   : > { %v2610_v22 = vpop.permute.xlu1 %1176  ;;  %v2612_v23 = vpop.permute.xlu0 %1178 }
 0x4e7   : > { %v2614_v24 = vpop.permute.xlu1 %1283  ;;  %v2616_v16 = vpop.permute.xlu0 %1285 }
 0x4eb   : > { %v2618_v20 = vpop.permute.xlu1 %1180  ;;  %v2620_v26 = vpop.permute.xlu0 %1182 }
 0x4ef   : > { %v1080_v10 = vpop.permute.xlu1 %1079  ;;  %v2622_v27 = vpop.permute.xlu0 %1287 }
 0x4f0   : > { %1103 = vst.msk [vmem:[#allocation5 + $0x8] sm:$0xff] %vm1101_vm1, %v1080_v10 }
 0x4f3   : > { %v1137_v11 = vpop.permute.xlu1 %1136  ;;  %v1206_v28 = vpop.permute.xlu0 %1205 }
 0x4f4   : > { %1160 = vst.msk [vmem:[#allocation5 + $0x8] sm:$0xff] %vm1158_vm2, %v1137_v11 }
 0x4f5   : > { %1230 = vst.msk [vmem:[#allocation5] sm:$0xff] %vm1229_vm4, %v1206_v28 }
 0x4f6   : > { %1194 = vst.msk [vmem:[#allocation5 + $0x8] sm:$0xff] %vm1192_vm3, %v1171_v7 }
 0x4f7   : > { %v1082_v12 = vpop.permute.xlu1 %1081  ;;  %v1208_v29 = vpop.permute.xlu0 %1207 }
 0x4f8   : > { %1104 = vst.msk [vmem:[#allocation5 + $0x10] sm:$0xff] %vm1101_vm1, %v1082_v12 }
 0x4f9   : > { %1231 = vst.msk [vmem:[#allocation5 + $0x8] sm:$0xff] %vm1229_vm4, %v1208_v29 }
 0x4fb   : > { %v1242_v13 = vpop.permute.xlu1 %1241  ;;  %v1084_v46 = vpop.permute.xlu0 %1083 }
 0x4fc   : > { %1266 = vst.msk [vmem:[#allocation5] sm:$0xff] %vm1265_vm5, %v1242_v13 }
 0x4fd   : > { %1105 = vst.msk [vmem:[#allocation5 + $0x18] sm:$0xff] %vm1101_vm1, %v1084_v46 }
 0x4fe   : > { %1300 = vst.msk [vmem:[#allocation5] sm:$0xff] %vm1299_vm6, %v1276_v56 }
 0x4ff   : > { %v1139_v30 = vpop.permute.xlu1 %1138  ;;  %v1244_v14 = vpop.permute.xlu0 %1243 }
 0x500   : > { %1161 = vst.msk [vmem:[#allocation5 + $0x10] sm:$0xff] %vm1158_vm2, %v1139_v30 }
 0x501   : > { %1267 = vst.msk [vmem:[#allocation5 + $0x8] sm:$0xff] %vm1265_vm5, %v1244_v14 }
 0x502   : > { %1195 = vst.msk [vmem:[#allocation5 + $0x10] sm:$0xff] %vm1192_vm3, %v1173_v59 }
 0x503   : > { %1301 = vst.msk [vmem:[#allocation5 + $0x8] sm:$0xff] %vm1299_vm6, %v1278_v9  ;;  %v1313_v31 = vpop.permute.xlu1 %1312  ;;  %v1141_v21 = vpop.permute.xlu0 %1140 }
 0x504   : > { %1337 = vst.msk [vmem:[#allocation5] sm:$0xff] %vm1336_vm7, %v1313_v31 }
 0x505   : > { %1162 = vst.msk [vmem:[#allocation5 + $0x18] sm:$0xff] %vm1158_vm2, %v1141_v21 }
 0x506   : > { %1196 = vst.msk [vmem:[#allocation5 + $0x18] sm:$0xff] %vm1192_vm3, %v1175_v15 }
 0x507   : > { %v1210_v17 = vpop.permute.xlu1 %1209  ;;  %v1315_v25 = vpop.permute.xlu0 %1314 }
 0x508   : > { %1232 = vst.msk [vmem:[#allocation5 + $0x10] sm:$0xff] %vm1229_vm4, %v1210_v17 }
 0x509   : > { %1338 = vst.msk [vmem:[#allocation5 + $0x8] sm:$0xff] %vm1336_vm7, %v1315_v25 }
 0x50b   : > { %v1349_v33 = vpop.permute.xlu1 %1348  ;;  %v1086_v45 = vpop.permute.xlu0 %1085 }
 0x50c   : > { %1373 = vst.msk [vmem:[#allocation5] sm:$0xff] %vm1372_vm8, %v1349_v33 }
 0x50d   : > { %1106 = vst.msk [vmem:[#allocation5 + $0x20] sm:$0xff] %vm1101_vm1, %v1086_v45 }
 0x50f   : > { %v1212_v35 = vpop.permute.xlu1 %1211  ;;  %v1246_v36 = vpop.permute.xlu0 %1245 }
 0x510   : > { %1233 = vst.msk [vmem:[#allocation5 + $0x18] sm:$0xff] %vm1229_vm4, %v1212_v35 }
 0x511   : > { %1268 = vst.msk [vmem:[#allocation5 + $0x10] sm:$0xff] %vm1265_vm5, %v1246_v36 }
 0x512   : > { %1302 = vst.msk [vmem:[#allocation5 + $0x10] sm:$0xff] %vm1299_vm6, %v1280_v18 }
 0x513   : > { %v1351_v37 = vpop.permute.xlu1 %1350  ;;  %v1088_v38 = vpop.permute.xlu0 %1087  ;;  %v1381_v39 = vld [vmem:[#allocation5] sm:$0xff] }
 0x514   : > { %1374 = vst.msk [vmem:[#allocation5 + $0x8] sm:$0xff] %vm1372_vm8, %v1351_v37  ;;  %1812 = vmatprep.mubr.msk.f32.mxu1 %vm1403_vm9, %v1381_v39 }
 0x515   : > { %1107 = vst.msk [vmem:[#allocation5 + $0x28] sm:$0xff] %vm1101_vm1, %v1088_v38 }
 0x517   : > { %v1143_v40 = vpop.permute.xlu1 %1142  ;;  %v1248_v41 = vpop.permute.xlu0 %1247 }
 0x518   : > { %1163 = vst.msk [vmem:[#allocation5 + $0x20] sm:$0xff] %vm1158_vm2, %v1143_v40 }
 0x519   : > { %1269 = vst.msk [vmem:[#allocation5 + $0x18] sm:$0xff] %vm1265_vm5, %v1248_v41 }
 0x51a   : > { %1197 = vst.msk [vmem:[#allocation5 + $0x20] sm:$0xff] %vm1192_vm3, %v2610_v22 }
 0x51b   : > { %1303 = vst.msk [vmem:[#allocation5 + $0x18] sm:$0xff] %vm1299_vm6, %v2608_v19  ;;  %v1317_v42 = vpop.permute.xlu1 %1316  ;;  %v1145_v43 = vpop.permute.xlu0 %1144  ;;  %v1382_v44 = vld [vmem:[#allocation5 + $0x8] sm:$0xff] }
 0x51c   : > { %1339 = vst.msk [vmem:[#allocation5 + $0x10] sm:$0xff] %vm1336_vm7, %v1317_v42  ;;  %1813 = vmatmul.mubr.msk.f32.vlgmr.msra.gmra.mrb[0].mxu1 %vm1403_vm9, %v1382_v44 }
 0x51d   : > { %1164 = vst.msk [vmem:[#allocation5 + $0x28] sm:$0xff] %vm1158_vm2, %v1145_v43 }
 0x51e   : > { %1198 = vst.msk [vmem:[#allocation5 + $0x28] sm:$0xff] %vm1192_vm3, %v2612_v23 }
 0x51f   : > { %v1214_v47 = vpop.permute.xlu1 %1213  ;;  %v1319_v50 = vpop.permute.xlu0 %1318 }
 0x520   : > { %1234 = vst.msk [vmem:[#allocation5 + $0x20] sm:$0xff] %vm1229_vm4, %v1214_v47 }
 0x521   : > { %1340 = vst.msk [vmem:[#allocation5 + $0x18] sm:$0xff] %vm1336_vm7, %v1319_v50 }
 0x523   : > { %v1353_v52 = vpop.permute.xlu1 %1352  ;;  %v1090_v53 = vpop.permute.xlu0 %1089 }
 0x524   : > { %1375 = vst.msk [vmem:[#allocation5 + $0x10] sm:$0xff] %vm1372_vm8, %v1353_v52 }
 0x525   : > { %1108 = vst.msk [vmem:[#allocation5 + $0x30] sm:$0xff] %vm1101_vm1, %v1090_v53 }
 0x527   : > { %v1216_v54 = vpop.permute.xlu1 %1215  ;;  %v1250_v55 = vpop.permute.xlu0 %1249 }
 0x528   : > { %1235 = vst.msk [vmem:[#allocation5 + $0x28] sm:$0xff] %vm1229_vm4, %v1216_v54 }
 0x529   : > { %1270 = vst.msk [vmem:[#allocation5 + $0x20] sm:$0xff] %vm1265_vm5, %v1250_v55 }
 0x52a   : > { %1304 = vst.msk [vmem:[#allocation5 + $0x20] sm:$0xff] %vm1299_vm6, %v2614_v24 }
 0x52b   : > { %v1355_v57 = vpop.permute.xlu1 %1354  ;;  %v1092_v58 = vpop.permute.xlu0 %1091  ;;  %v1383_v48 = vld [vmem:[#allocation5 + $0x10] sm:$0xff] }
 0x52c   : > { %1376 = vst.msk [vmem:[#allocation5 + $0x18] sm:$0xff] %vm1372_vm8, %v1355_v57  ;;  %1815 = vmatprep.mubr.msk.f32.mxu1 %vm1403_vm9, %v1383_v48 }
 0x52d   : > { %1109 = vst.msk [vmem:[#allocation5 + $0x38] sm:$0xff] %vm1101_vm1, %v1092_v58 }
 0x52f   : > { %v1147_v0 = vpop.permute.xlu1 %1146  ;;  %v1252_v60 = vpop.permute.xlu0 %1251 }
 0x530   : > { %1165 = vst.msk [vmem:[#allocation5 + $0x30] sm:$0xff] %vm1158_vm2, %v1147_v0 }
 0x531   : > { %1271 = vst.msk [vmem:[#allocation5 + $0x28] sm:$0xff] %vm1265_vm5, %v1252_v60 }
 0x532   : > { %1199 = vst.msk [vmem:[#allocation5 + $0x30] sm:$0xff] %vm1192_vm3, %v2618_v20 }
 0x533   : > { %1305 = vst.msk [vmem:[#allocation5 + $0x28] sm:$0xff] %vm1299_vm6, %v2616_v16  ;;  %v1321_v61 = vpop.permute.xlu1 %1320  ;;  %v1149_v62 = vpop.permute.xlu0 %1148  ;;  %v1384_v63 = vld [vmem:[#allocation5 + $0x18] sm:$0xff] }
 0x534   : > { %1341 = vst.msk [vmem:[#allocation5 + $0x20] sm:$0xff] %vm1336_vm7, %v1321_v61  ;;  %1816 = vmatmul.mubr.msk.f32.gmra.mrb[2].mxu1 %vm1403_vm9, %v1384_v63 }
 0x535   : > { %1166 = vst.msk [vmem:[#allocation5 + $0x38] sm:$0xff] %vm1158_vm2, %v1149_v62 }
 0x536   : > { %1200 = vst.msk [vmem:[#allocation5 + $0x38] sm:$0xff] %vm1192_vm3, %v2620_v26 }
 0x537   : > { %v1218_v4 = vpop.permute.xlu1 %1217  ;;  %v1323_v5 = vpop.permute.xlu0 %1322 }
 0x538   : > { %1236 = vst.msk [vmem:[#allocation5 + $0x30] sm:$0xff] %vm1229_vm4, %v1218_v4 }
 0x539   : > { %1342 = vst.msk [vmem:[#allocation5 + $0x28] sm:$0xff] %vm1336_vm7, %v1323_v5 }
 0x53b   : > { %v1357_v6 = vpop.permute.xlu1 %1356  ;;  %v1220_v51 = vpop.permute.xlu0 %1219 }
 0x53c   : > { %1377 = vst.msk [vmem:[#allocation5 + $0x20] sm:$0xff] %vm1372_vm8, %v1357_v6 }
 0x53d   : > { %1237 = vst.msk [vmem:[#allocation5 + $0x38] sm:$0xff] %vm1229_vm4, %v1220_v51 }
 0x53f   : > { %v1254_v7 = vpop.permute.xlu1 %1253  ;;  %v1359_v8 = vpop.permute.xlu0 %1358 }
 0x540   : > { %1272 = vst.msk [vmem:[#allocation5 + $0x30] sm:$0xff] %vm1265_vm5, %v1254_v7 }
 0x541   : > { %1378 = vst.msk [vmem:[#allocation5 + $0x28] sm:$0xff] %vm1372_vm8, %v1359_v8 }
 0x542   : > { %1306 = vst.msk [vmem:[#allocation5 + $0x30] sm:$0xff] %vm1299_vm6, %v2622_v27 }
 0x543   : > { %v1256_v56 = vpop.permute.xlu1 %1255  ;;  %v1325_v9 = vpop.permute.xlu0 %1324  ;;  %v1385_v59 = vld [vmem:[#allocation5 + $0x20] sm:$0xff] }
 0x544   : > { %1273 = vst.msk [vmem:[#allocation5 + $0x38] sm:$0xff] %vm1265_vm5, %v1256_v56  ;;  %1818 = vmatprep.mubr.msk.f32.mxu1 %vm1403_vm9, %v1385_v59 }
 0x545   : > { %1343 = vst.msk [vmem:[#allocation5 + $0x30] sm:$0xff] %vm1336_vm7, %v1325_v9 }
 0x546   : > { %1307 = vst.msk [vmem:[#allocation5 + $0x38] sm:$0xff] %vm1299_vm6, %v2589_v49 }
 0x547   : > { %1344 = vst.msk [vmem:[#allocation5 + $0x38] sm:$0xff] %vm1336_vm7, %v2597_v1  ;;  %v1361_v15 = vpop.permute.xlu0 %1360  ;;  %v1363_v18 = vpop.permute.xlu1 %1362  ;;  %v2706_v1 = vld [vmem:[%s2752_s4] sm:$0x7] }
 0x548   : > { %v1386_v19 = vld [vmem:[#allocation5 + $0x28] sm:$0xff]  ;;  %1379 = vst.msk [vmem:[#allocation5 + $0x30] sm:$0xff] %vm1372_vm8, %v1361_v15  ;;  %1380 = vst.msk [vmem:[#allocation5 + $0x38] sm:$0xff] %vm1372_vm8, %v1363_v18  ;;  %v1402_v26 = vrot.slane %v2706_v1, %v727_v34 }
 0x549   : > { %1819 = vmatmul.mubr.msk.f32.gmra.mrb[4].mxu1 %vm1403_vm9, %v1386_v19 }
 0x54f   : > { %v1387_v22 = vld [vmem:[#allocation5 + $0x30] sm:$0xff]  ;;  %v1388_v23 = vld [vmem:[#allocation5 + $0x38] sm:$0xff] }
 0x550   : > { %1821 = vmatprep.mubr.msk.f32.mxu1 %vm1403_vm9, %v1387_v22 }
 0x551   : > { %1822 = vmatmul.mubr.msk.f32.gmra.mrb[6].mxu1 %vm1403_vm9, %v1388_v23 }
 0x5ef   : > { %v1814_v24 = vpop.f32.mrb[0].mxu1 }
 0x5f0   : > { %v1494_v49 = vpop.f32.mrb[1].mxu1  ;;  %v1500_v10 = vadd.f32 %v1814_v24, %v1402_v26 }
 0x5f1   : > { %v1495_v27 = vadd.f32 %v1494_v49, %v1402_v26 }
 0x5f2   : > { %v1534_v28 = vsel %vm241_vm0, %v1500_v10, 0.0 }
 0x5f3   : > { %v1533_v12 = vsel %vm241_vm0, %v1495_v27, 0.0 }
 0x5f4   : > { %v1535_v13 = vadd.f32 %v1534_v28, %v1533_v12 }
 0x607   : > { %v1817_v16 = vpop.f32.mrb[2].mxu1 }
 0x608   : > { %v1504_v20 = vpop.f32.mrb[3].mxu1  ;;  %v1510_v30 = vadd.f32 %v1817_v16, %v1402_v26 }
 0x609   : > { %v1505_v11 = vadd.f32 %v1504_v20, %v1402_v26 }
 0x60a   : > { %v1538_v17 = vsel %vm241_vm0, %v1510_v30, 0.0 }
 0x60b   : > { %v1536_v29 = vsel %vm241_vm0, %v1505_v11, 0.0 }
 0x60c   : > { %v1537_v31 = vadd.f32 %v1536_v29, %v1535_v13 }
 0x60e   : > { %v1539_v34 = vadd.f32 %v1538_v17, %v1537_v31 }
 0x61c   : > { %v1820_v46 = vpop.f32.mrb[4].mxu1 }
 0x61d   : > { %v1514_v14 = vpop.f32.mrb[5].mxu1  ;;  %v1520_v33 = vadd.f32 %v1820_v46, %v1402_v26 }
 0x61e   : > { %v1515_v21 = vadd.f32 %v1514_v14, %v1402_v26 }
 0x61f   : > { %v1542_v37 = vsel %vm241_vm0, %v1520_v33, 0.0 }
 0x620   : > { %v1540_v25 = vsel %vm241_vm0, %v1515_v21, 0.0 }
 0x621   : > { %v1541_v45 = vadd.f32 %v1540_v25, %v1539_v34 }
 0x623   : > { %v1543_v40 = vadd.f32 %v1542_v37, %v1541_v45  ;;  %v1632_v45 = vrot.slane %v2706_v1, %v961_v3 }
 0x624   : > { %v1823_v35 = vpop.f32.mrb[6].mxu1 }
 0x625   : > { %v1524_v36 = vpop.f32.mrb[7].mxu1  ;;  %v1530_v38 = vadd.f32 %v1823_v35, %v1402_v26 }
 0x626   : > { %v1525_v39 = vadd.f32 %v1524_v36, %v1402_v26 }
 0x627   : > { %v1546_v43 = vsel %vm241_vm0, %v1530_v38, 0.0 }
 0x628   : > { %v1544_v41 = vsel %vm241_vm0, %v1525_v39, 0.0 }
 0x629   : > { %v1545_v42 = vadd.f32 %v1544_v41, %v1543_v40 }
 0x62b   : > { %v1547_v44 = vadd.f32 %v1546_v43, %v1545_v42 }
 0x62d   : > { %1548 = vadd.xlane.f32.xlu0 %v1547_v44 }
 0x6ba   : > { %v1549_v47 = vpop.xlane.xlu0 %1548 }
 0x6bb   : > { %v1550_v50 = vrot.slane %v1549_v47, 4 }
 0x6bd   : > { %v1551_v52 = vadd.f32 %v1550_v50, %v1549_v47 }
 0x6bf   : > { %v1552_v53 = vrot.slane %v1551_v52, 2 }
 0x6c1   : > { %v1553_v54 = vadd.f32 %v1552_v53, %v1551_v52 }
 0x6c3   : > { %v1554_v55 = vrot.slane %v1553_v54, 1 }
 0x6c5   : > { %v1555_v57 = vadd.f32 %v1554_v55, %v1553_v54 }
 0x6c7   : > { %1854 = vpush %v1555_v57 }
 0x6f8   : > { %s1855_s16 = spop %1854 }
 0x6f9   : > { %s1559_s26 = smul.f32 0.001953125, %s1855_s16 }
 0x6fb   : > { %v1560_v58 = vstv %s1559_s26 }
 0x6fc   : > { %v1561_v48 = vsub.f32 %v1495_v27, %v1560_v58  ;;  %v1562_v0 = vsub.f32 %v1500_v10, %v1560_v58  ;;  %v1563_v60 = vsub.f32 %v1505_v11, %v1560_v58  ;;  %v1564_v61 = vsub.f32 %v1510_v30, %v1560_v58 }
 0x6fd   : > { %v1565_v62 = vsub.f32 %v1515_v21, %v1560_v58  ;;  %v1566_v6 = vsub.f32 %v1520_v33, %v1560_v58  ;;  %v1567_v9 = vsub.f32 %v1525_v39, %v1560_v58  ;;  %v1568_v19 = vsub.f32 %v1530_v38, %v1560_v58 }
 0x6fe   : > { %v1569_v63 = vmul.f32 %v1561_v48, %v1561_v48  ;;  %v1570_v4 = vmul.f32 %v1562_v0, %v1562_v0  ;;  %v1571_v5 = vmul.f32 %v1563_v60, %v1563_v60  ;;  %v1572_v51 = vmul.f32 %v1564_v61, %v1564_v61 }
 0x6ff   : > { %v1573_v59 = vmul.f32 %v1565_v62, %v1565_v62  ;;  %v1574_v22 = vmul.f32 %v1566_v6, %v1566_v6  ;;  %v1575_v49 = vmul.f32 %v1567_v9, %v1567_v9  ;;  %v1576_v26 = vmul.f32 %v1568_v19, %v1568_v19 }
 0x700   : > { %v1577_v7 = vsel %vm241_vm0, %v1569_v63, 0.0  ;;  %v1578_v8 = vsel %vm241_vm0, %v1570_v4, 0.0  ;;  %v1580_v15 = vsel %vm241_vm0, %v1571_v5, 0.0  ;;  %v1582_v23 = vsel %vm241_vm0, %v1572_v51, 0.0 }
 0x701   : > { %v1579_v56 = vadd.f32 %v1578_v8, %v1577_v7  ;;  %v1584_v16 = vsel %vm241_vm0, %v1573_v59, 0.0  ;;  %v1586_v10 = vsel %vm241_vm0, %v1574_v22, 0.0  ;;  %v1588_v11 = vsel %vm241_vm0, %v1575_v49, 0.0 }
 0x702   : > { %v1590_v12 = vsel %vm241_vm0, %v1576_v26, 0.0  ;;  %v1620_v33 = vrot.slane %v2706_v1, %v949_v2 }
 0x703   : > { %v1581_v18 = vadd.f32 %v1580_v15, %v1579_v56 }
 0x705   : > { %v1583_v24 = vadd.f32 %v1582_v23, %v1581_v18 }
 0x707   : > { %v1585_v20 = vadd.f32 %v1584_v16, %v1583_v24 }
 0x709   : > { %v1587_v27 = vadd.f32 %v1586_v10, %v1585_v20 }
 0x70b   : > { %v1589_v28 = vadd.f32 %v1588_v11, %v1587_v27 }
 0x70d   : > { %v1591_v29 = vadd.f32 %v1590_v12, %v1589_v28 }
 0x70f   : > { %1592 = vadd.xlane.f32.xlu1 %v1591_v29 }
 0x79c   : > { %v1593_v13 = vpop.xlane.xlu1 %1592 }
 0x79d   : > { %v1594_v46 = vrot.slane %v1593_v13, 4 }
 0x79f   : > { %v1595_v30 = vadd.f32 %v1594_v46, %v1593_v13 }
 0x7a1   : > { %v1596_v14 = vrot.slane %v1595_v30, 2 }
 0x7a3   : > { %v1597_v31 = vadd.f32 %v1596_v14, %v1595_v30 }
 0x7a5   : > { %v1598_v21 = vrot.slane %v1597_v31, 1 }
 0x7a7   : > { %v1599_v17 = vadd.f32 %v1598_v21, %v1597_v31 }
 0x7a9   : > { %1856 = vpush %v1599_v17 }
 0x7da   : > { %s1857_s9 = spop %1856 }
 0x7db   : > { %s1603_s10 = smul.f32 0.001953125, %s1857_s9 }
 0x7dd   : > { %s1604_s11 = sadd.f32 1e-05, %s1603_s10 }
 0x7df   : > { %v1605_v25 = vstv %s1604_s11 }
 0x7e0   : > { %1884 = vrsqrt.f32 %v1605_v25 }
 0x7ea   : > { %v1885_v34 = vpop.eup %1884 }
 0x7eb   : > { %1858 = vpush %v1885_v34 }
 0x81c   : > { %s1859_s12 = spop %1858 }
 0x81d   : > { %v1608_v35 = vstv %s1859_s12 }
 0x81e   : > { %v1609_v36 = vmul.f32 %v1608_v35, %v1561_v48  ;;  %v1610_v37 = vmul.f32 %v1608_v35, %v1562_v0  ;;  %v1611_v38 = vmul.f32 %v1608_v35, %v1563_v60  ;;  %v1612_v39 = vmul.f32 %v1608_v35, %v1564_v61 }
 0x81f   : > { %v1613_v40 = vmul.f32 %v1608_v35, %v1565_v62  ;;  %v1614_v41 = vmul.f32 %v1608_v35, %v1566_v6  ;;  %v1615_v42 = vmul.f32 %v1608_v35, %v1567_v9  ;;  %v1616_v43 = vmul.f32 %v1608_v35, %v1568_v19 }
 0x820   : > { %v1621_v44 = vmul.f32 %v1620_v33, %v1609_v36  ;;  %v1622_v47 = vmul.f32 %v1620_v33, %v1610_v37  ;;  %v1623_v50 = vmul.f32 %v1620_v33, %v1611_v38  ;;  %v1624_v52 = vmul.f32 %v1620_v33, %v1612_v39 }
 0x821   : > { %v1625_v2 = vmul.f32 %v1620_v33, %v1613_v40  ;;  %v1626_v53 = vmul.f32 %v1620_v33, %v1614_v41  ;;  %v1627_v54 = vmul.f32 %v1620_v33, %v1615_v42  ;;  %v1628_v32 = vmul.f32 %v1620_v33, %v1616_v43 }
 0x822   : > { %v1633_v55 = vadd.f32 %v1632_v45, %v1621_v44  ;;  %v1634_v3 = vadd.f32 %v1632_v45, %v1622_v47  ;;  %v1635_v1 = vadd.f32 %v1632_v45, %v1623_v50  ;;  %v1636_v57 = vadd.f32 %v1632_v45, %v1624_v52 }
 0x823   : > { %v1637_v58 = vadd.f32 %v1632_v45, %v1625_v2  ;;  %v1638_v48 = vadd.f32 %v1632_v45, %v1626_v53  ;;  %v1639_v0 = vadd.f32 %v1632_v45, %v1627_v54  ;;  %v1640_v60 = vadd.f32 %v1632_v45, %v1628_v32 }
 0x824   : > { %v1641_v61 = vmax.f32 %v1633_v55, 0.0  ;;  %v1642_v62 = vmax.f32 %v1634_v3, 0.0  ;;  %v1643_v63 = vmax.f32 %v1635_v1, 0.0  ;;  %v1644_v4 = vmax.f32 %v1636_v57, 0.0 }
 0x825   : > { %v1645_v5 = vmax.f32 %v1637_v58, 0.0  ;;  %v1646_v6 = vmax.f32 %v1638_v48, 0.0  ;;  %v1647_v51 = vmax.f32 %v1639_v0, 0.0  ;;  %v1648_v7 = vmax.f32 %v1640_v60, 0.0 }
 0x826   : > { %1649 = vst.msk [vmem:[%s224_s17] sm:$0xff] %vm241_vm0, %v1641_v61  ;;  %1650 = vst.msk [vmem:[%s224_s17 + $0x8] sm:$0xff] %vm241_vm0, %v1642_v62 }
 0x827   : > { %1651 = vst.msk [vmem:[%s224_s17 + $0x10] sm:$0xff] %vm241_vm0, %v1643_v63  ;;  %1652 = vst.msk [vmem:[%s224_s17 + $0x18] sm:$0xff] %vm241_vm0, %v1644_v4 }
 0x828   : > { %1653 = vst.msk [vmem:[%s224_s17 + $0x20] sm:$0xff] %vm241_vm0, %v1645_v5  ;;  %1654 = vst.msk [vmem:[%s224_s17 + $0x28] sm:$0xff] %vm241_vm0, %v1646_v6 }
 0x829   : > { %1655 = vst.msk [vmem:[%s224_s17 + $0x30] sm:$0xff] %vm241_vm0, %v1647_v51  ;;  %1656 = vst.msk [vmem:[%s224_s17 + $0x38] sm:$0xff] %vm241_vm0, %v1648_v7 }
 0x82a PF: > { %s15_s18 = sadd.s32 1, %s1892_s18  }
 0x82b   : > { %p12_p4 = scmp.ge.s32.totalorder %s15_s18, 4  }
 0x82d   :  { %14 = sbr.rel (!%p12_p4) target bundleno = 1 (0x1), region = 72 }

</bundles_post_ra>
